<compile_context>
chip_gen: v7x
topology: tpu7x:2x2x1
jax: 0.10.0
libtpu: 0.0.40
codegen_flags: <defaults>
</compile_context>

<pallas_src>
import math
import functools
import numpy as np
import jax
import jax.numpy as jnp
from jax import lax
from jax.experimental import pallas as pl
from jax.experimental.pallas import tpu as pltpu

GROUPS = 32      # nn.GroupNorm(32, channels)
EPS = 1e-5       # PyTorch GroupNorm default eps


# ----------------------------------------------------------------------------
# Kernel 1: GroupNorm statistics on channel-major (C, TS) tiles.
# Finalized once per batch element into per-channel scale/shift (C, 1).
# ----------------------------------------------------------------------------
def groupnorm_stats_kernel(x_ref, gamma_ref, beta_ref, grp_ref,
                           scale_ref, shift_ref, sum_s, sumsq_s, *, hw):
    ti = pl.program_id(1)

    @pl.when(ti == 0)
    def _init():
        sum_s[...] = jnp.zeros(sum_s.shape, sum_s.dtype)
        sumsq_s[...] = jnp.zeros(sumsq_s.shape, sumsq_s.dtype)

    x = x_ref[...]                                           # (C, TS) f32
    sum_s[...] += jnp.sum(x, axis=1, keepdims=True)          # (C, 1)
    sumsq_s[...] += jnp.sum(x * x, axis=1, keepdims=True)    # (C, 1)

    @pl.when(ti == pl.num_programs(1) - 1)
    def _finalize():
        C = sum_s.shape[0]
        inv_n = 1.0 / float(hw * (C // GROUPS))
        # grp_ref is the (C, C) same-group indicator: group-reduce and broadcast
        # back to channels in one matmul each (runs once per batch element).
        mean_c = jnp.dot(grp_ref[...], sum_s[...],
                         preferred_element_type=jnp.float32) * inv_n     # (C, 1)
        msq_c = jnp.dot(grp_ref[...], sumsq_s[...],
                        preferred_element_type=jnp.float32) * inv_n      # (C, 1)
        # TODO(synk): one-pass E[x^2]-E[x]^2 can cancel for badly-centred inputs;
        # the clamp avoids NaN but a compensated / two-pass variance would be safer.
        var_c = jnp.maximum(msq_c - mean_c * mean_c, 0.0)
        rstd_c = lax.rsqrt(var_c + EPS)
        scale_c = gamma_ref[...] * rstd_c
        scale_ref[...] = scale_c
        shift_ref[...] = beta_ref[...] - mean_c * scale_c


# ----------------------------------------------------------------------------
# Kernel 2: fused K/V 1x1 conv.  GroupNorm FMA + one bf16 (TS,C)x(C,2C) MXU
# matmul; K and V are written as separate row-major (HW, C) slabs so the
# attention kernel gets fully contiguous k/v tile DMAs.  (C^-1/4 is folded
# into the K columns at wrapper time.)
# ----------------------------------------------------------------------------
def kv_proj_kernel(x_ref, scale_ref, shift_ref, wkv_ref, k_ref, v_ref):
    C = x_ref.shape[0]
    xn = x_ref[...] * scale_ref[...] + shift_ref[...]        # (C, TS) f32, fused GN
    xnt = jnp.transpose(xn).astype(jnp.bfloat16)             # (TS, C); XLU hides under HBM
    kv = jnp.dot(xnt, wkv_ref[...],
                 preferred_element_type=jnp.float32)         # (TS, 2C)
    k_ref[...] = kv[:, :C].astype(jnp.bfloat16)              # lane-dense bf16 stores
    v_ref[...] = kv[:, C:].astype(jnp.bfloat16)


# ----------------------------------------------------------------------------
# Kernel 3: flash-style attention + q projection (prologue) + output projection
# and residual (epilogue).  Grid = (B, n_q_tiles, n_kv_tiles); kv is reduction.
# Softmax runs in the exp2 domain: log2(e)*C^-1/4 folded into Wq, C^-1/4 into Wk.
# ----------------------------------------------------------------------------
def flash_attention_kernel(x_ref, scale_ref, shift_ref, k_ref, v_ref,
                           wq_ref, wp_ref, bp_ref, o_ref,
                           m_s, l_s, acc_s, q_s):
    ki = pl.program_id(2)

    @pl.when(ki == 0)
    def _prologue():
        m_s[...] = jnp.full(m_s.shape, -jnp.inf, m_s.dtype)
        l_s[...] = jnp.zeros(l_s.shape, l_s.dtype)
        acc_s[...] = jnp.zeros(acc_s.shape, acc_s.dtype)
        # Fused q projection: q never touches HBM; the x tile is already resident
        # for the residual, so this is one extra matmul amortized over all kv steps.
        xn = x_ref[...] * scale_ref[...] + shift_ref[...]                 # (C, TQ) f32
        xnt = jnp.transpose(xn).astype(jnp.bfloat16)                      # (TQ, C)
        q = jnp.dot(xnt, wq_ref[...], preferred_element_type=jnp.float32)
        q_s[...] = q.astype(jnp.bfloat16)

    # scores (TQ, TK): canonical rhs-transposed flash matmul, f32 accumulation.
    s = lax.dot_general(q_s[...], k_ref[...], (((1,), (1,)), ((), ())),
                        preferred_element_type=jnp.float32)

    m_prev = m_s[...]
    m_new = jnp.maximum(m_prev, jnp.max(s, axis=-1, keepdims=True))
    alpha = jnp.exp2(m_prev - m_new)                  # exp2: log2e already folded into Wq
    p = jnp.exp2(s - m_new)
    l_s[...] = alpha * l_s[...] + jnp.sum(p, axis=-1, keepdims=True)
    acc_s[...] = alpha * acc_s[...] + jnp.dot(p.astype(jnp.bfloat16), v_ref[...],
                                              preferred_element_type=jnp.float32)
    m_s[...] = m_new

    @pl.when(ki == pl.num_programs(2) - 1)
    def _epilogue():
        h = acc_s[...] / l_s[...]                     # exact divide: off the kv hot loop
        out = jnp.dot(h.astype(jnp.bfloat16), wp_ref[...],
                      preferred_element_type=jnp.float32) + bp_ref[...]   # (TQ, C)
        # back to channel-major, add residual; lane-dense (C, TQ) f32 store
        o_ref[...] = (jnp.transpose(out) + x_ref[...]).astype(o_ref.dtype)


# ----------------------------------------------------------------------------
# Wrapper
# ----------------------------------------------------------------------------
def _pick_tile(n, preferred, mult):
    """Largest divisor of n that is <= preferred and a multiple of `mult`; else n."""
    if n <= preferred:
        return n
    for t in range(preferred, mult - 1, -1):
        if n % t == 0 and t % mult == 0:
            return t
    return n


def _vmem_limit_bytes():
    cap = 128 * 1024 * 1024
    try:  # generation-dependent cap: ~48 MiB on v7x (64 MiB/TC), 64 MiB on v5e/v6e
        cap = int(pltpu.get_tpu_info().vmem_capacity_bytes)
    except Exception:
        pass
    return int(min(64 * 1024 * 1024, (cap * 3) // 4))


def attention_block(x_nchw, params, num_heads=1, *, tq=512, tk=512, ts=1024):
    # TODO(synk): only num_heads=1 (the module default) is implemented; PyTorch's
    # per-head channel-chunk layout for num_heads>1 is not reproduced here.
    assert num_heads == 1
    B, C, H, W = x_nchw.shape
    HW = H * W
    assert C % GROUPS == 0, "GroupNorm(32, C) requires C % 32 == 0"
    assert C % 128 == 0, "kernel assumes a lane-dense channel dim (C % 128 == 0)"

    f32, bf16 = jnp.float32, jnp.bfloat16
    gamma, beta, w_qkv, w_proj, b_proj = params

    # NCHW -> (B, C, HW): a free reshape — no HBM transpose round trip in or out.
    x = x_nchw.reshape(B, C, HW).astype(f32)

    TS = _pick_tile(HW, ts, 128)   # lane dim of (C, TS) tiles (stages 1-2)
    TQ = _pick_tile(HW, tq, 128)   # lane dim of (C, TQ) x / out tiles (stage 3)
    TK = _pick_tile(HW, tk, 8)     # sublane dim of (TK, C) k / v tiles (stage 3)
    # keep >= 2 parallel grid points so both TensorCores stay busy on v7x
    while B * (HW // TQ) < 2 and TQ % 256 == 0 and HW % (TQ // 2) == 0:
        TQ //= 2

    vmem = _vmem_limit_bytes()

    def cparams(sem):
        return pltpu.CompilerParams(dimension_semantics=sem, vmem_limit_bytes=vmem)

    gamma2 = gamma.reshape(C, 1).astype(f32)
    beta2 = beta.reshape(C, 1).astype(f32)
    gs = C // GROUPS
    grp = (jnp.arange(C)[:, None] // gs == jnp.arange(C)[None, :] // gs).astype(f32)  # (C, C)

    # ---- Stage 1: GroupNorm stats -> per-channel scale / shift ------------------
    scale_c, shift_c = pl.pallas_call(
        functools.partial(groupnorm_stats_kernel, hw=HW),
        out_shape=(jax.ShapeDtypeStruct((B, C, 1), f32),
                   jax.ShapeDtypeStruct((B, C, 1), f32)),
        grid_spec=pltpu.PrefetchScalarGridSpec(
            num_scalar_prefetch=0,
            grid=(B, HW // TS),
            in_specs=[
                pl.BlockSpec((None, C, TS), lambda b, t: (b, 0, t)),   # x tile (chan-major)
                pl.BlockSpec((C, 1), lambda b, t: (0, 0)),             # gamma
                pl.BlockSpec((C, 1), lambda b, t: (0, 0)),             # beta
                pl.BlockSpec((C, C), lambda b, t: (0, 0)),             # same-group indicator
            ],
            out_specs=[
                pl.BlockSpec((None, C, 1), lambda b, t: (b, 0, 0)),
                pl.BlockSpec((None, C, 1), lambda b, t: (b, 0, 0)),
            ],
            scratch_shapes=[pltpu.VMEM((C, 1), f32), pltpu.VMEM((C, 1), f32)],
        ),
        compiler_params=cparams(("parallel", "arbitrary")),
    )(x, gamma2, beta2, grp)

    # ---- Stage 2: fused K/V projection (bf16), scales folded into the weights ---
    scale_qk = float(C) ** -0.25           # reference scales q and k each by C^-1/4
    log2e = math.log2(math.e)              # softmax runs in the exp2 domain
    wq_t = (jnp.transpose(w_qkv[:C]).astype(f32) * (scale_qk * log2e)).astype(bf16)   # (C, C)
    wk_t = jnp.transpose(w_qkv[C:2 * C]).astype(f32) * scale_qk
    wv_t = jnp.transpose(w_qkv[2 * C:]).astype(f32)
    wkv_t = jnp.concatenate([wk_t, wv_t], axis=1).astype(bf16)                        # (C, 2C)

    k_rm, v_rm = pl.pallas_call(
        kv_proj_kernel,
        out_shape=(jax.ShapeDtypeStruct((B, HW, C), bf16),
                   jax.ShapeDtypeStruct((B, HW, C), bf16)),
        grid_spec=pltpu.PrefetchScalarGridSpec(
            num_scalar_prefetch=0,
            grid=(B, HW // TS),
            in_specs=[
                pl.BlockSpec((None, C, TS), lambda b, t: (b, 0, t)),   # x tile
                pl.BlockSpec((None, C, 1), lambda b, t: (b, 0, 0)),    # GN scale
                pl.BlockSpec((None, C, 1), lambda b, t: (b, 0, 0)),    # GN shift
                pl.BlockSpec((C, 2 * C), lambda b, t: (0, 0)),         # [Wk|Wv]^T (bf16)
            ],
            out_specs=[
                pl.BlockSpec((None, TS, C), lambda b, t: (b, t, 0)),   # K (row-major)
                pl.BlockSpec((None, TS, C), lambda b, t: (b, t, 0)),   # V (row-major)
            ],
        ),
        compiler_params=cparams(("parallel", "parallel")),
    )(x, scale_c, shift_c, wkv_t)

    # ---- Stage 3: flash attention + q proj + out proj + residual -----------------
    wp_t = jnp.transpose(w_proj).astype(bf16)   # (C, C)
    bp2 = b_proj.reshape(1, C).astype(f32)

    out = pl.pallas_call(
        flash_attention_kernel,
        out_shape=jax.ShapeDtypeStruct((B, C, HW), f32),
        grid_spec=pltpu.PrefetchScalarGridSpec(
            num_scalar_prefetch=0,
            grid=(B, HW // TQ, HW // TK),
            in_specs=[
                pl.BlockSpec((None, C, TQ), lambda b, qi, ki: (b, 0, qi)),  # x (residual + q)
                pl.BlockSpec((None, C, 1), lambda b, qi, ki: (b, 0, 0)),    # GN scale
                pl.BlockSpec((None, C, 1), lambda b, qi, ki: (b, 0, 0)),    # GN shift
                pl.BlockSpec((None, TK, C), lambda b, qi, ki: (b, ki, 0)),  # k tile (contiguous)
                pl.BlockSpec((None, TK, C), lambda b, qi, ki: (b, ki, 0)),  # v tile (contiguous)
                pl.BlockSpec((C, C), lambda b, qi, ki: (0, 0)),             # Wq^T (scaled, bf16)
                pl.BlockSpec((C, C), lambda b, qi, ki: (0, 0)),             # Wproj^T (bf16)
                pl.BlockSpec((1, C), lambda b, qi, ki: (0, 0)),             # bproj
            ],
            out_specs=pl.BlockSpec((None, C, TQ), lambda b, qi, ki: (b, 0, qi)),
            scratch_shapes=[
                pltpu.VMEM((TQ, 1), f32),      # running max (log2 domain)
                pltpu.VMEM((TQ, 1), f32),      # running denominator
                pltpu.VMEM((TQ, C), f32),      # output accumulator
                pltpu.VMEM((TQ, C), bf16),     # q tile (computed in prologue)
            ],
        ),
        compiler_params=cparams(("parallel", "parallel", "arbitrary")),
    )(x, scale_c, shift_c, k_rm, v_rm, wq_t, wp_t, bp2)

    return out.reshape(B, C, H, W)   # channel-major throughout: reshape only, no transpose


# ----------------------------------------------------------------------------
# Pure-JAX reference of the PyTorch forward (NCHW), for verification.
# ----------------------------------------------------------------------------
def reference(x_nchw, params):
    B, C, H, W = x_nchw.shape
    gamma, beta, w_qkv, w_proj, b_proj = params
    xg = x_nchw.reshape(B, GROUPS, C // GROUPS, H, W)
    mean = xg.mean(axis=(2, 3, 4), keepdims=True)
    var = xg.var(axis=(2, 3, 4), keepdims=True)
    xn = ((xg - mean) / jnp.sqrt(var + EPS)).reshape(B, C, H, W)
    xn = xn * gamma.reshape(1, C, 1, 1) + beta.reshape(1, C, 1, 1)
    qkv = jnp.einsum('oc,bchw->bohw', w_qkv, xn).reshape(B, 3 * C, H * W)
    q, k, v = qkv[:, :C], qkv[:, C:2 * C], qkv[:, 2 * C:]
    scale = 1.0 / math.sqrt(math.sqrt(C))
    attn = jnp.einsum('bct,bcs->bts', q * scale, k * scale)
    attn = jax.nn.softmax(attn, axis=-1)
    h = jnp.einsum('bts,bcs->bct', attn, v).reshape(B, C, H, W)
    h = jnp.einsum('oc,bchw->bohw', w_proj, h) + b_proj.reshape(1, C, 1, 1)
    return h + x_nchw


if __name__ == "__main__":
    key = jax.random.PRNGKey(0)
    B, C, H, W = 2, 128, 16, 16        # C multiple of 32 (GroupNorm) and 128 (lane-dense)
    k1, k2, k3, k4, k5, k6 = jax.random.split(key, 6)

    x = jax.random.normal(k1, (B, C, H, W), jnp.float32)
    gamma = 1.0 + 0.1 * jax.random.normal(k2, (C,), jnp.float32)
    beta = 0.1 * jax.random.normal(k3, (C,), jnp.float32)
    w_qkv = 0.05 * jax.random.normal(k4, (3 * C, C), jnp.float32)   # qkv conv weight (3C, C)
    w_proj = 0.05 * jax.random.normal(k5, (C, C), jnp.float32)      # proj conv weight (C, C)
    b_proj = 0.05 * jax.random.normal(k6, (C,), jnp.float32)        # proj conv bias  (C,)
    params = (gamma, beta, w_qkv, w_proj, b_proj)

    # small tiles so the test exercises multi-tile stats accumulation, multiple
    # q tiles and the online-softmax loop over multiple kv tiles (grid (2,2,2)).
    out = attention_block(x, params, tq=128, tk=128, ts=128)
    jax.block_until_ready(out)

    ref = reference(x, params)
    # bf16 MXU operands -> slightly looser tolerance than pure f32.
    np.testing.assert_allclose(np.asarray(out), np.asarray(ref), rtol=2e-2, atol=2e-2)
    print("KERNEL_OK")
</pallas_src>

<mosaic_0001>
module attributes {stable_mosaic.version = 11 : i64} {
  func.func @groupnorm_stats_kernel(%arg0: i32, %arg1: i32, %arg2: memref<1x128x128xf32, #tpu.memory_space<vmem>>, %arg3: memref<128x1xf32, #tpu.memory_space<vmem>>, %arg4: memref<128x1xf32, #tpu.memory_space<vmem>>, %arg5: memref<128x128xf32, #tpu.memory_space<vmem>>, %arg6: memref<1x128x1xf32, #tpu.memory_space<vmem>>, %arg7: memref<1x128x1xf32, #tpu.memory_space<vmem>>, %arg8: memref<128x1xf32, #tpu.memory_space<vmem>>, %arg9: memref<128x1xf32, #tpu.memory_space<vmem>>) attributes {dimension_semantics = [#tpu.dimension_semantics<parallel>, #tpu.dimension_semantics<arbitrary>], iteration_bounds = array<i64: 2, 2>, scalar_prefetch = 0 : i64, scratch_operands = 2 : i64, tpu.core_type = #tpu.core_type<tc>, window_params = [{transform_indices = @transform_0, window_bounds = array<i64: 1, 128, 128>}, {pipeline_mode = #tpu.pipeline_mode<synchronous>, transform_indices = @transform_1, window_bounds = array<i64: 128, 1>}, {pipeline_mode = #tpu.pipeline_mode<synchronous>, transform_indices = @transform_2, window_bounds = array<i64: 128, 1>}, {pipeline_mode = #tpu.pipeline_mode<synchronous>, transform_indices = @transform_3, window_bounds = array<i64: 128, 128>}, {transform_indices = @transform_4, window_bounds = array<i64: 1, 128, 1>}, {transform_indices = @transform_5, window_bounds = array<i64: 1, 128, 1>}]} {
    %c0_i32 = arith.constant 0 : i32
    %0 = arith.cmpi eq, %arg1, %c0_i32 : i32
    %1 = arith.extui %0 : i1 to i32
    %c0_i32_0 = arith.constant 0 : i32
    %2 = arith.cmpi ne, %1, %c0_i32_0 : i32
    scf.if %2 {
      %cst_13 = arith.constant 0.000000e+00 : f32
      %19 = vector.broadcast %cst_13 : f32 to vector<128x1xf32>
      %c0_14 = arith.constant 0 : index
      %c0_15 = arith.constant 0 : index
      %20 = vector.load %arg8[%c0_14, %c0_15] : memref<128x1xf32, #tpu.memory_space<vmem>>, vector<128x1xf32>
      tpu.vector_store %arg8[%c0_14, %c0_15], %19 {strides = array<i32>} : memref<128x1xf32, #tpu.memory_space<vmem>>, vector<128x1xf32>,
      %cst_16 = arith.constant 0.000000e+00 : f32
      %21 = vector.broadcast %cst_16 : f32 to vector<128x1xf32>
      %c0_17 = arith.constant 0 : index
      %c0_18 = arith.constant 0 : index
      %22 = vector.load %arg9[%c0_17, %c0_18] : memref<128x1xf32, #tpu.memory_space<vmem>>, vector<128x1xf32>
      tpu.vector_store %arg9[%c0_17, %c0_18], %21 {strides = array<i32>} : memref<128x1xf32, #tpu.memory_space<vmem>>, vector<128x1xf32>,
    } else {
    }
    %c0 = arith.constant 0 : index
    %c0_1 = arith.constant 0 : index
    %c0_2 = arith.constant 0 : index
    %3 = vector.load %arg2[%c0, %c0_1, %c0_2] : memref<1x128x128xf32, #tpu.memory_space<vmem>>, vector<1x128x128xf32>
    %4 = vector.shape_cast %3 : vector<1x128x128xf32> to vector<128x128xf32>
    %c0_3 = arith.constant 0 : index
    %c0_4 = arith.constant 0 : index
    %5 = vector.load %arg8[%c0_3, %c0_4] : memref<128x1xf32, #tpu.memory_space<vmem>>, vector<128x1xf32>
    %cst = arith.constant dense<0.000000e+00> : vector<128xf32>
    %6 = vector.multi_reduction <add>, %4, %cst [1] : vector<128x128xf32> to vector<128xf32>
    %7 = vector.shape_cast %6 : vector<128xf32> to vector<128x1xf32>
    %8 = arith.addf %5, %7 : vector<128x1xf32>
    %c0_5 = arith.constant 0 : index
    %c0_6 = arith.constant 0 : index
    %9 = vector.load %arg8[%c0_5, %c0_6] : memref<128x1xf32, #tpu.memory_space<vmem>>, vector<128x1xf32>
    tpu.vector_store %arg8[%c0_5, %c0_6], %8 {strides = array<i32>} : memref<128x1xf32, #tpu.memory_space<vmem>>, vector<128x1xf32>,
    %c0_7 = arith.constant 0 : index
    %c0_8 = arith.constant 0 : index
    %10 = vector.load %arg9[%c0_7, %c0_8] : memref<128x1xf32, #tpu.memory_space<vmem>>, vector<128x1xf32>
    %11 = arith.mulf %4, %4 : vector<128x128xf32>
    %cst_9 = arith.constant dense<0.000000e+00> : vector<128xf32>
    %12 = vector.multi_reduction <add>, %11, %cst_9 [1] : vector<128x128xf32> to vector<128xf32>
    %13 = vector.shape_cast %12 : vector<128xf32> to vector<128x1xf32>
    %14 = arith.addf %10, %13 : vector<128x1xf32>
    %c0_10 = arith.constant 0 : index
    %c0_11 = arith.constant 0 : index
    %15 = vector.load %arg9[%c0_10, %c0_11] : memref<128x1xf32, #tpu.memory_space<vmem>>, vector<128x1xf32>
    tpu.vector_store %arg9[%c0_10, %c0_11], %14 {strides = array<i32>} : memref<128x1xf32, #tpu.memory_space<vmem>>, vector<128x1xf32>,
    %c1_i32 = arith.constant 1 : i32
    %16 = arith.cmpi eq, %arg1, %c1_i32 : i32
    %17 = arith.extui %16 : i1 to i32
    %c0_i32_12 = arith.constant 0 : i32
    %18 = arith.cmpi ne, %17, %c0_i32_12 : i32
    scf.if %18 {
      %c0_13 = arith.constant 0 : index
      %c0_14 = arith.constant 0 : index
      %19 = vector.load %arg5[%c0_13, %c0_14] : memref<128x128xf32, #tpu.memory_space<vmem>>, vector<128x128xf32>
      %c0_15 = arith.constant 0 : index
      %c0_16 = arith.constant 0 : index
      %20 = vector.load %arg8[%c0_15, %c0_16] : memref<128x1xf32, #tpu.memory_space<vmem>>, vector<128x1xf32>
      %cst_17 = arith.constant dense<0.000000e+00> : vector<128x1xf32>
      %21 = tpu.matmul %19, %20, %cst_17 {dimension_numbers = #tpu.dot_dimension_numbers<[1], [0], [0], [1], [0, 0, 1, 1], [], []>} : vector<128x128xf32>, vector<128x1xf32>, vector<128x1xf32> -> vector<128x1xf32>
      %cst_18 = arith.constant 9.765625E-4 : f32
      %22 = vector.broadcast %cst_18 : f32 to vector<128x1xf32>
      %23 = arith.mulf %21, %22 : vector<128x1xf32>
      %c0_19 = arith.constant 0 : index
      %c0_20 = arith.constant 0 : index
      %24 = vector.load %arg5[%c0_19, %c0_20] : memref<128x128xf32, #tpu.memory_space<vmem>>, vector<128x128xf32>
      %c0_21 = arith.constant 0 : index
      %c0_22 = arith.constant 0 : index
      %25 = vector.load %arg9[%c0_21, %c0_22] : memref<128x1xf32, #tpu.memory_space<vmem>>, vector<128x1xf32>
      %cst_23 = arith.constant dense<0.000000e+00> : vector<128x1xf32>
      %26 = tpu.matmul %24, %25, %cst_23 {dimension_numbers = #tpu.dot_dimension_numbers<[1], [0], [0], [1], [0, 0, 1, 1], [], []>} : vector<128x128xf32>, vector<128x1xf32>, vector<128x1xf32> -> vector<128x1xf32>
      %cst_24 = arith.constant 9.765625E-4 : f32
      %27 = vector.broadcast %cst_24 : f32 to vector<128x1xf32>
      %28 = arith.mulf %26, %27 : vector<128x1xf32>
      %29 = arith.mulf %23, %23 : vector<128x1xf32>
      %30 = arith.subf %28, %29 : vector<128x1xf32>
      %cst_25 = arith.constant 0.000000e+00 : f32
      %31 = vector.broadcast %cst_25 : f32 to vector<128x1xf32>
      %32 = arith.maximumf %30, %31 : vector<128x1xf32>
      %cst_26 = arith.constant 9.99999974E-6 : f32
      %33 = vector.broadcast %cst_26 : f32 to vector<128x1xf32>
      %34 = arith.addf %32, %33 : vector<128x1xf32>
      %35 = math.rsqrt %34 : vector<128x1xf32>
      %c0_27 = arith.constant 0 : index
      %c0_28 = arith.constant 0 : index
      %36 = vector.load %arg3[%c0_27, %c0_28] : memref<128x1xf32, #tpu.memory_space<vmem>>, vector<128x1xf32>
      %37 = arith.mulf %36, %35 : vector<128x1xf32>
      %c0_29 = arith.constant 0 : index
      %c0_30 = arith.constant 0 : index
      %c0_31 = arith.constant 0 : index
      %38 = vector.load %arg6[%c0_29, %c0_30, %c0_31] : memref<1x128x1xf32, #tpu.memory_space<vmem>>, vector<1x128x1xf32>
      %39 = vector.shape_cast %38 : vector<1x128x1xf32> to vector<128x1xf32>
      %40 = vector.shape_cast %37 : vector<128x1xf32> to vector<1x128x1xf32>
      tpu.vector_store %arg6[%c0_29, %c0_30, %c0_31], %40 {strides = array<i32>} : memref<1x128x1xf32, #tpu.memory_space<vmem>>, vector<1x128x1xf32>,
      %c0_32 = arith.constant 0 : index
      %c0_33 = arith.constant 0 : index
      %41 = vector.load %arg4[%c0_32, %c0_33] : memref<128x1xf32, #tpu.memory_space<vmem>>, vector<128x1xf32>
      %42 = arith.mulf %23, %37 : vector<128x1xf32>
      %43 = arith.subf %41, %42 : vector<128x1xf32>
      %c0_34 = arith.constant 0 : index
      %c0_35 = arith.constant 0 : index
      %c0_36 = arith.constant 0 : index
      %44 = vector.load %arg7[%c0_34, %c0_35, %c0_36] : memref<1x128x1xf32, #tpu.memory_space<vmem>>, vector<1x128x1xf32>
      %45 = vector.shape_cast %44 : vector<1x128x1xf32> to vector<128x1xf32>
      %46 = vector.shape_cast %43 : vector<128x1xf32> to vector<1x128x1xf32>
      tpu.vector_store %arg7[%c0_34, %c0_35, %c0_36], %46 {strides = array<i32>} : memref<1x128x1xf32, #tpu.memory_space<vmem>>, vector<1x128x1xf32>,
    } else {
    }
    return
  }
  func.func @transform_0(%arg0: i32, %arg1: i32) -> (i32, i32, i32) {
    %c0_i32 = arith.constant 0 : i32
    %c0_i32_0 = arith.constant 0 : i32
    return %arg0, %c0_i32, %arg1 : i32, i32, i32
  }
  func.func @transform_1(%arg0: i32, %arg1: i32) -> (i32, i32) {
    %c0_i32 = arith.constant 0 : i32
    %c0_i32_0 = arith.constant 0 : i32
    %c0_i32_1 = arith.constant 0 : i32
    return %c0_i32, %c0_i32_0 : i32, i32
  }
  func.func @transform_2(%arg0: i32, %arg1: i32) -> (i32, i32) {
    %c0_i32 = arith.constant 0 : i32
    %c0_i32_0 = arith.constant 0 : i32
    %c0_i32_1 = arith.constant 0 : i32
    return %c0_i32, %c0_i32_0 : i32, i32
  }
  func.func @transform_3(%arg0: i32, %arg1: i32) -> (i32, i32) {
    %c0_i32 = arith.constant 0 : i32
    %c0_i32_0 = arith.constant 0 : i32
    %c0_i32_1 = arith.constant 0 : i32
    return %c0_i32, %c0_i32_0 : i32, i32
  }
  func.func @transform_4(%arg0: i32, %arg1: i32) -> (i32, i32, i32) {
    %c0_i32 = arith.constant 0 : i32
    %c0_i32_0 = arith.constant 0 : i32
    %c0_i32_1 = arith.constant 0 : i32
    return %arg0, %c0_i32, %c0_i32_0 : i32, i32, i32
  }
  func.func @transform_5(%arg0: i32, %arg1: i32) -> (i32, i32, i32) {
    %c0_i32 = arith.constant 0 : i32
    %c0_i32_0 = arith.constant 0 : i32
    %c0_i32_1 = arith.constant 0 : i32
    return %arg0, %c0_i32, %c0_i32_0 : i32, i32, i32
  }
}

</mosaic_0001>

<bundles_post_ra>
// kernel: tpu_custom_call.1
= control target key start
LH: loop header
LB: loop body
LE: loop exit
PB: predicated region body
PF: predicated region fallthrough
CT: control target
= control target key end

     0   :  { %s2671_s0 = inlined_call_operand.hbm [shape: f32[2,128,256], index: 0, kind: input, shape index: {}]   ;;  %s2672_s1 = inlined_call_operand.hbm [shape: f32[128,1], index: 1, kind: input, shape index: {}]   ;;  %s2673_s2 = inlined_call_operand.hbm [shape: f32[128,1], index: 2, kind: input, shape index: {}]   ;;  %s2674_s3 = inlined_call_operand.hbm [shape: f32[128,128], index: 3, kind: input, shape index: {}]   ;;  %s2675_s4 = inlined_call_operand.hbm [shape: f32[2,128,1], index: 4, kind: output, shape index: {0}]   ;;  %s2676_s5 = inlined_call_operand.hbm [shape: f32[2,128,1], index: 5, kind: output, shape index: {1}]  }
   0x1   :  { %2693 = sst [smem:[#allocation24_spill]] %s2672_s1 }
   0x2   :  { %2694 = sst [smem:[#allocation25_spill]] %s2673_s2 }
   0x3   :  { %2695 = sst [smem:[#allocation26_spill]] %s2675_s4 }
   0x4   :  { %2696 = sst [smem:[#allocation27_spill]] %s2676_s5 }
   0x5   :  { %11 = vsyncpa [#allocation5], 0 }
   0x6   :  { %13 = vsyncpa [#allocation5 + $0x1], 0 }
   0x7   :  { %14 = vsyncpa [#allocation8], 0 }
   0x8   :  { %15 = vsyncpa [#allocation11], 0 }
   0x9   :  { %16 = vsyncpa [#allocation6], 0 }
   0xa   :  { %18 = vsyncpa [#allocation6 + $0x1], 0 }
   0xb   :  { %19 = vsyncpa [#allocation14], 0 }
   0xc   :  { %21 = vsyncpa [#allocation14 + $0x1], 0  ;;  %s2056_s18 = smov 0   ;;  %s2058_s19 = smov 0  }
   0xd   :  { %s2060_s20 = smov 0   ;;  %s2062_s21 = smov 0  }
   0xe   :  { %s2064_s22 = smov 0   ;;  %s2066_s23 = smov 0  }
   0xf   :  { %s2068_s24 = smov 0   ;;  %s2070_s25 = smov 0  }
  0x10   :  { %s2072_s26 = smov 0   ;;  %s2074_s27 = smov 0  }
  0x11   :  { %s2076_s28 = smov 0  }
  0x12 LB: > { %2697 = sst [smem:[#allocation20_spill]] %s1972_s18  ;;  %s1291_s29 = sadd.s32 4294967295, %s2012_s28   ;;  %s2012_s28 = sphi %s2076_s28, %s27_s28   ;;  %s2008_s27 = sphi %s2074_s27, %s2738_s27   ;;  %s2004_s26 = sphi %s2072_s26, %s2737_s26   ;;  %s2000_s25 = sphi %s2070_s25, %s2736_s25   ;;  %s1996_s24 = sphi %s2068_s24, %s2735_s24   ;;  %s1992_s23 = sphi %s2066_s23, %s2734_s23   ;;  %s1988_s22 = sphi %s2064_s22, %s2733_s22   ;;  %s1984_s21 = sphi %s2062_s21, %s2732_s21   ;;  %s1980_s20 = sphi %s2060_s20, %s2731_s20   ;;  %s1976_s19 = sphi %s2058_s19, %s2730_s19   ;;  %s1972_s18 = sphi %s2056_s18, %s2729_s18  }
  0x13   : > { %2698 = sst [smem:[#allocation21_spill]] %s2012_s28  ;;  %s1292_s30 = sadd.s32 4294967294, %s2012_s28  }
  0x14   : > { %p55_p0 = scmp.ne.s32.totalorder %s1992_s23, %s1988_s22  ;;  %p56_p1 = scmp.eq.s32.totalorder %s2012_s28, 0 }
  0x15   : > { %p61_p2 = scmp.ne.s32.totalorder %s1988_s22, %s1984_s21  ;;  %p2116_p3 = scmp.eq.s32.totalorder %s1291_s29, 0 }
  0x16   : > { %p2121_p4 = por %p56_p1, %p55_p0  ;;  %p147_p5 = scmp.ne.s32.totalorder %s1980_s20, %s1976_s19 }
  0x17   : > { %s2699_s7 = scalar_select %p2116_p3, 1, 0 }
  0x18   : > { %p2129_p6 = por %p2116_p3, %p61_p2  ;;  %p148_p7 = scmp.eq.s32.totalorder %s1291_s29, 3 }
  0x19   : > { %p153_p8 = scmp.ne.s32.totalorder %s1976_s19, %s1972_s18  ;;  %p154_p9 = scmp.eq.s32.totalorder %s1292_s30, 3 }
  0x1a   : > { %s2701_s10 = scalar_select %p2129_p6, 1, 0 }
  0x1b   : > { %p2135_p10 = por %p148_p7, %p147_p5  ;;  %p1293_p11 = scmp.ge.s32.totalorder %s2012_s28, 1 }
  0x1c   : > { %p2140_p12 = por %p154_p9, %p153_p8  ;;  %p187_p13 = scmp.lt.s32.totalorder %s2012_s28, 5 }
  0x1d   : > { %s2702_s11 = scalar_select %p2135_p10, 1, 0 }
  0x1e   : > { %s2704_s12 = scalar_select %p2140_p12, 1, 0 }
  0x1f   : > { %2703 = sst [smem:[#allocation22_spill]] %s2702_s11  ;;  %p2145_p0 = pnand %p1293_p11, %p187_p13 }
  0x20   : > { %2705 = sst [smem:[#allocation23_spill]] %s2704_s12  ;;  %s2014_s14 = smov [#allocation7]  }
  0x21   : > { %s2706_s13 = scalar_select %p2145_p0, 1, 0 }
  0x22   : > { %s199_s15 = sshll.u32 %s2014_s14, 4  ;;  %p1578_p1 = pneg %p2145_p0  ;;  %s2149_s15 = int_to_ptr.vmem [resolvable:$true] %s199_s15 }
  0x23   : > { %p1602_p2 = scmp.lt.s32.totalorder %s2012_s28, 4  ;;  %s2015_s21 = smov [#allocation9]  }
  0x24   : > { %p2156_p5 = pnand %p1578_p1, %p2116_p3  ;;  %s212_s29 = sshll.u32 %s2015_s21, 4  ;;  %s2166_s29 = int_to_ptr.vmem [resolvable:$true] %s212_s29 }
  0x25   : > { %p2162_p7 = pnand %p1602_p2, %p2121_p4  ;;  %s2709_s1 = sld [smem:[#allocation24_spill]] }
  0x26   : > { %p2176_p9 = pneg %p2156_p5 }
  0x27   : > { %s2708_s17 = scalar_select %p2162_p7, 1, 0 }
  0x2b   : > { %s1736_s6 = scalar_lea.hbm %s2709_s1, 2048 }
  0x2c   : > { %p1737_p8 = scmp.ne.s32.totalorder %s2709_s1, %s1736_s6  ;;  %p1743_p13 = scmp.lt.u32.totalorder %s1736_s6, %s2709_s1 }
  0x2e   : > { %p1739_p4 = pnand %p2176_p9, %p1737_p8 }
  0x30   : > { %p1740_p11 = pneg %p1739_p4 }
  0x32   : > { %p1745_p1 = pnand %p1743_p13, %p1740_p11 }
  0x34   : > { %1748 = shalt.err (!%p1745_p1)
}
  0x35   : > { %s1749_s8 = scalar_lea.vmem %s2149_s15, 2048  ;;  %p1757_p3 = scmp.lt.s32.totalorder %s2149_s15, %s2149_s15 }
  0x36   : > { %p1750_p2 = scmp.ne.s32.totalorder %s2149_s15, %s1749_s8  ;;  %p1758_p6 = scmp.lt.s32.totalorder %s1749_s8, %s1749_s8 }
  0x38   : > { %p1752_p12 = pnand %p1750_p2, %p2176_p9  ;;  %p1759_p8 = por %p1758_p6, %p1757_p3 }
  0x3a   : > { %p1753_p10 = pneg %p1752_p12 }
  0x3c   : > { %p1760_p4 = pnand %p1759_p8, %p1753_p10 }
  0x3e   : > { %1763 = shalt.err (!%p1760_p4)
}
  0x3f   : > { %s2691_s12 = smov 128   ;;  %s2692_s18 = smov 8  }
  0x40   : > { %1581 = dma.hbm_to_vmem [thread:$0]  (!%p2156_p5), %s2709_s1, 2048, %s2149_s15, [#allocation8], %s2691_s12, %s2691_s12, %s2692_s18  }
  0x41   : > { %s2711_s2 = sld [smem:[#allocation25_spill]] }
  0x47   : > { %s1764_s8 = scalar_lea.hbm %s2711_s2, 2048 }
  0x48   : > { %p1765_p3 = scmp.ne.s32.totalorder %s2711_s2, %s1764_s8  ;;  %p1771_p12 = scmp.lt.u32.totalorder %s1764_s8, %s2711_s2 }
  0x4a   : > { %p1767_p6 = pnand %p1765_p3, %p2176_p9 }
  0x4c   : > { %p1768_p10 = pneg %p1767_p6 }
  0x4e   : > { %p1773_p11 = pnand %p1771_p12, %p1768_p10 }
  0x50   : > { %1776 = shalt.err (!%p1773_p11)
}
  0x51   : > { %s1777_s15 = scalar_lea.vmem %s2166_s29, 2048  ;;  %p1785_p8 = scmp.lt.s32.totalorder %s2166_s29, %s2166_s29 }
  0x52   : > { %p1778_p13 = scmp.ne.s32.totalorder %s2166_s29, %s1777_s15  ;;  %p1786_p4 = scmp.lt.s32.totalorder %s1777_s15, %s1777_s15 }
  0x54   : > { %p1780_p1 = pnand %p1778_p13, %p2176_p9  ;;  %p1787_p3 = por %p1786_p4, %p1785_p8 }
  0x56   : > { %p1781_p2 = pneg %p1780_p1 }
  0x58   : > { %p1788_p6 = pnand %p1787_p3, %p1781_p2 }
  0x5a   : > { %1791 = shalt.err (!%p1788_p6)
}
  0x5b   : > { %1584 = dma.hbm_to_vmem [thread:$0]  (!%p2156_p5), %s2711_s2, 2048, %s2166_s29, [#allocation8], %s2691_s12, %s2691_s12, %s2692_s18  }
  0x5c   : > { %s2018_s28 = smov [#allocation10]   ;;  %s1792_s14 = scalar_lea.hbm %s2674_s3, 2048 }
  0x5d   : > { %s225_s11 = sshll.u32 %s2018_s28, 4  ;;  %p1793_p10 = scmp.ne.s32.totalorder %s2674_s3, %s1792_s14  ;;  %s226_s11 = int_to_ptr.vmem [resolvable:$true] %s225_s11 }
  0x5e   : > { %p1799_p13 = scmp.lt.u32.totalorder %s1792_s14, %s2674_s3 }
  0x5f   : > { %p1795_p12 = pnand %p1793_p10, %p2176_p9 }
  0x61   : > { %p1796_p11 = pneg %p1795_p12 }
  0x63   : > { %p1801_p1 = pnand %p1799_p13, %p1796_p11 }
  0x65   : > { %1804 = shalt.err (!%p1801_p1)
}
  0x66   : > { %s1805_s29 = scalar_lea.vmem %s226_s11, 2048  ;;  %p1813_p3 = scmp.lt.s32.totalorder %s226_s11, %s226_s11 }
  0x67   : > { %p1806_p2 = scmp.ne.s32.totalorder %s226_s11, %s1805_s29  ;;  %p1814_p6 = scmp.lt.s32.totalorder %s1805_s29, %s1805_s29 }
  0x69   : > { %p1808_p8 = pnand %p1806_p2, %p2176_p9  ;;  %p1815_p0 = por %p1814_p6, %p1813_p3 }
  0x6b   : > { %p1809_p4 = pneg %p1808_p8 }
  0x6d   : > { %p1816_p7 = pnand %p1815_p0, %p1809_p4 }
  0x6f   : > { %1819 = shalt.err (!%p1816_p7)
}
  0x70   : > { %1587 = dma.hbm_to_vmem [thread:$0]  (!%p2156_p5), %s2674_s3, 2048, %s226_s11, [#allocation11], %s2691_s12, %s2691_s12, %s2692_s18  }
  0x71   : > { %s36_s9 = sadd.s32 1, %s2004_s26  ;;  %s39_s5 = sadd.s32 1, %s2008_s27 }
  0x72   : > { %p37_p0 = scmp.ge.s32.totalorder %s36_s9, 2  ;;  %s239_s28 = sand.u32 1, %s1992_s23  }
  0x73   : > { %s1298_s16 = sshll.u32 %s239_s28, 7  ;;  %s1299_s30 = sshll.u32 %s2008_s27, 5 }
  0x74   : > { %s2740_s9 = smov (%p37_p0, %s36_s9), 0  ;;  %s2742_s5 = smov (!%p37_p0, %s39_s5), %s2008_s27 }
  0x75   : > { %s44_s6 = ssub.s32 %s2004_s26, %s2740_s9  ;;  %p41_p7 = scmp.ge.s32.totalorder %s2742_s5, 2 }
  0x76   : > { %s248_s14 = sadd.s32 %s2004_s26, %s1299_s30  ;;  %s243_s11 = scalar_lea.vmem [#allocation4], %s1298_s16 }
  0x77   : > { %s251_s21 = sshll.u32 %s243_s11, 4  ;;  %s2744_s5 = smov (%p41_p7, %s2742_s5), 0  ;;  %s2259_s21 = int_to_ptr.vmem [resolvable:$true] %s251_s21 }
  0x78   : > { %s1300_s8 = sshll.u32 %s248_s14, 7  ;;  %s43_s15 = ssub.s32 %s2008_s27, %s2744_s5 }
  0x79   : > { %s2266_s4 = scalar_lea.hbm %s2671_s0, %s1300_s8  ;;  %s45_s30 = sor.u32 %s44_s6, %s43_s15 }
  0x7a   : > { %p135_p5 = scmp.eq.s32.totalorder %s43_s15, 0  ;;  %p46_p9 = scmp.eq.s32.totalorder %s45_s30, 0 }
  0x7b   : > { %s2712_s16 = sadd.s32 1, %s1980_s20  ;;  %s2713_s12 = sadd.s32 1, %s1992_s23 }
  0x7c   : > { %s2271_s11 = scalar_select %p135_p5, %s1980_s20, %s2712_s16  }
  0x7d   : > { %s2276_s14 = scalar_select %p46_p9, %s1992_s23, %s2713_s12  }
  0x7e   : > { %s2278_s18 = scalar_lea.sflag [#allocation5], %s239_s28  ;;  %s1820_s2 = scalar_lea.hbm %s2266_s4, 2048 }
  0x7f   : > { %p1821_p10 = scmp.ne.s32.totalorder %s2266_s4, %s1820_s2  ;;  %p2714_p12 = scmp.ne.s32.totalorder %s2708_s17, 0 }
  0x80   : > { %s1825_s15 = scalar_lea.hbm %s2671_s0, 8192  ;;  %p1826_p2 = scmp.lt.u32.totalorder %s2266_s4, %s2671_s0 }
  0x81   : > { %p1822_p11 = pneg %p2714_p12  ;;  %p1827_p8 = scmp.lt.u32.totalorder %s1825_s15, %s1820_s2 }
  0x82   : > { %p1829_p3 = scmp.lt.u32.totalorder %s1820_s2, %s2266_s4 }
  0x83   : > { %p1823_p13 = pnand %p1822_p11, %p1821_p10  ;;  %p1828_p4 = por %p1827_p8, %p1826_p2 }
  0x85   : > { %p1824_p1 = pneg %p1823_p13  ;;  %p1830_p6 = por %p1829_p3, %p1828_p4 }
  0x87   : > { %p1831_p0 = pnand %p1830_p6, %p1824_p1 }
  0x89   : > { %1834 = shalt.err (!%p1831_p0)
}
  0x8a   : > { %s1835_s12 = scalar_lea.vmem %s2259_s21, 2048  ;;  %s2019_s28 = smov [#allocation4]  }
  0x8b   : > { %p1836_p7 = scmp.ne.s32.totalorder %s2259_s21, %s1835_s12  ;;  %s1840_s30 = sshll.u32 %s2019_s28, 4  ;;  %s1841_s30 = int_to_ptr.vmem [resolvable:$false] %s1840_s30 }
  0x8c   : > { %s1842_s16 = scalar_lea.vmem %s1841_s30, 4096  ;;  %p1843_p10 = scmp.lt.s32.totalorder %s2259_s21, %s1841_s30 }
  0x8d   : > { %p1838_p5 = pnand %p1836_p7, %p1822_p11  ;;  %p1844_p13 = scmp.lt.s32.totalorder %s1842_s16, %s1835_s12 }
  0x8f   : > { %p1839_p9 = pneg %p1838_p5  ;;  %p1845_p2 = por %p1844_p13, %p1843_p10 }
  0x91   : > { %p1846_p8 = pnand %p1845_p2, %p1839_p9 }
  0x93   : > { %1849 = shalt.err (!%p1846_p8)
}
  0x94   : > { %s2020_s2 = smov 256   ;;  %s2715_s8 = smov 8  }
  0x95   : > { %s2716_s6 = smov 128   ;;  %p2717_p11 = scmp.ne.s32.totalorder %s2706_s13, 0 }
  0x96   : > { %1591 = dma.hbm_to_vmem [thread:$0]  (!%p2714_p12), %s2266_s4, 2048, %s2259_s21, %s2278_s18, %s2020_s2, %s2716_s6, %s2715_s8  }
  0x97   : > { %263 = sbr.rel (%p2717_p11) target bundleno = 723 (0x2d3), region = 36  ;;  %s265_s15 = sand.u32 (!%p2717_p11), 1, %s1988_s22  }
  0x98   : > { %s1302_s29 = sshll.u32 (!%p2717_p11), %s265_s15, 7  ;;  %s266_s1 = scalar_lea.sflag (!%p2717_p11), [#allocation5], %s265_s15 }
  0x99   : > { %s2311_s12 = scalar_lea.vmem (!%p2717_p11), [#allocation4], %s1302_s29  ;;  %p2718_p1 = scmp.ne.s32.totalorder (!%p2717_p11), %s2701_s10, 0 }
  0x9e   : > { %1951 = dma.done.wait (%p2718_p1), %s266_s1, 2048  }
  0x9f   : > { %1953 = vsyncadd (%p2718_p1), %s266_s1, 4294965248  ;;  %p2719_p4 = scmp.ne.s32.totalorder %s2699_s7, 0 }
  0xa1   : > { %1955 = dma.done.wait (%p2719_p4), [#allocation8], 4096  }
  0xa2   : > { %1957 = vsyncadd (%p2719_p4), [#allocation8], 4294963200 }
  0xa3   : > { %1959 = dma.done.wait (%p2719_p4), [#allocation11], 2048  }
  0xa4   : > { %1961 = vsyncadd (%p2719_p4), [#allocation11], 4294965248  ;;  %s2326_s13 = sand.u32 1, %s1976_s19   ;;  %p1308_p12 = scmp.ne.s32.totalorder %s1996_s24, 0 }
  0xa5   : > { %s1306_s17 = sshll.u32 %s2326_s13, 7  ;;  %vm317_vm0 = vcmask (!%p1308_p12), 7168   ;;  %v2021_v0 = vmov (!%p1308_p12), 0.0  }
  0xa6   : > { %s2329_s18 = scalar_lea.vmem [#allocation12], %s1306_s17  ;;  %s2331_s10 = scalar_lea.vmem [#allocation13], %s1306_s17  ;;  %318 = vst.msk [vmem:[#allocation2] sm:$0xff] (!%p1308_p12), %vm317_vm0, %v2021_v0  ;;  %319 = vst.msk [vmem:[#allocation2 + $0x8] sm:$0xff] (!%p1308_p12), %vm317_vm0, %v2021_v0 }
  0xa7   : > { %316 = sbr.rel (%p1308_p12) target bundleno = 182 (0xb6), region = 56  ;;  %320 = vst.msk [vmem:[#allocation2 + $0x10] sm:$0xff] (!%p1308_p12), %vm317_vm0, %v2021_v0  ;;  %321 = vst.msk [vmem:[#allocation2 + $0x18] sm:$0xff] (!%p1308_p12), %vm317_vm0, %v2021_v0 }
  0xa8   : > { %322 = vst.msk [vmem:[#allocation2 + $0x20] sm:$0xff] (!%p1308_p12), %vm317_vm0, %v2021_v0  ;;  %323 = vst.msk [vmem:[#allocation2 + $0x28] sm:$0xff] (!%p1308_p12), %vm317_vm0, %v2021_v0 }
  0xa9   : > { %324 = vst.msk [vmem:[#allocation2 + $0x30] sm:$0xff] (!%p1308_p12), %vm317_vm0, %v2021_v0  ;;  %325 = vst.msk [vmem:[#allocation2 + $0x38] sm:$0xff] (!%p1308_p12), %vm317_vm0, %v2021_v0 }
  0xaa   : > { %326 = vst.msk [vmem:[#allocation2 + $0x40] sm:$0xff] (!%p1308_p12), %vm317_vm0, %v2021_v0  ;;  %327 = vst.msk [vmem:[#allocation2 + $0x48] sm:$0xff] (!%p1308_p12), %vm317_vm0, %v2021_v0 }
  0xab   : > { %328 = vst.msk [vmem:[#allocation2 + $0x50] sm:$0xff] (!%p1308_p12), %vm317_vm0, %v2021_v0  ;;  %329 = vst.msk [vmem:[#allocation2 + $0x58] sm:$0xff] (!%p1308_p12), %vm317_vm0, %v2021_v0 }
  0xac   : > { %330 = vst.msk [vmem:[#allocation2 + $0x60] sm:$0xff] (!%p1308_p12), %vm317_vm0, %v2021_v0  ;;  %331 = vst.msk [vmem:[#allocation2 + $0x68] sm:$0xff] (!%p1308_p12), %vm317_vm0, %v2021_v0 }
  0xad   : > { %332 = vst.msk [vmem:[#allocation2 + $0x70] sm:$0xff] (!%p1308_p12), %vm317_vm0, %v2021_v0  ;;  %333 = vst.msk [vmem:[#allocation2 + $0x78] sm:$0xff] (!%p1308_p12), %vm317_vm0, %v2021_v0 }
  0xae   : > { %334 = vst.msk [vmem:[#allocation3] sm:$0xff] %vm317_vm0, %v2021_v0  ;;  %335 = vst.msk [vmem:[#allocation3 + $0x8] sm:$0xff] %vm317_vm0, %v2021_v0 }
  0xaf   : > { %336 = vst.msk [vmem:[#allocation3 + $0x10] sm:$0xff] %vm317_vm0, %v2021_v0  ;;  %337 = vst.msk [vmem:[#allocation3 + $0x18] sm:$0xff] %vm317_vm0, %v2021_v0 }
  0xb0   : > { %338 = vst.msk [vmem:[#allocation3 + $0x20] sm:$0xff] %vm317_vm0, %v2021_v0  ;;  %339 = vst.msk [vmem:[#allocation3 + $0x28] sm:$0xff] %vm317_vm0, %v2021_v0 }
  0xb1   : > { %340 = vst.msk [vmem:[#allocation3 + $0x30] sm:$0xff] %vm317_vm0, %v2021_v0  ;;  %341 = vst.msk [vmem:[#allocation3 + $0x38] sm:$0xff] %vm317_vm0, %v2021_v0 }
  0xb2   : > { %342 = vst.msk [vmem:[#allocation3 + $0x40] sm:$0xff] %vm317_vm0, %v2021_v0  ;;  %343 = vst.msk [vmem:[#allocation3 + $0x48] sm:$0xff] %vm317_vm0, %v2021_v0 }
  0xb3   : > { %344 = vst.msk [vmem:[#allocation3 + $0x50] sm:$0xff] %vm317_vm0, %v2021_v0  ;;  %345 = vst.msk [vmem:[#allocation3 + $0x58] sm:$0xff] %vm317_vm0, %v2021_v0 }
  0xb4   : > { %346 = vst.msk [vmem:[#allocation3 + $0x60] sm:$0xff] %vm317_vm0, %v2021_v0  ;;  %347 = vst.msk [vmem:[#allocation3 + $0x68] sm:$0xff] %vm317_vm0, %v2021_v0 }
  0xb5   : > { %348 = vst.msk [vmem:[#allocation3 + $0x70] sm:$0xff] %vm317_vm0, %v2021_v0  ;;  %349 = vst.msk [vmem:[#allocation3 + $0x78] sm:$0xff] %vm317_vm0, %v2021_v0 }
  0xb6 PF: > { %v352_v1 = vld [vmem:[%s2311_s12 + $0x10] sm:$0xff]  ;;  %v350_v2 = vld [vmem:[%s2311_s12] sm:$0xff]  ;;  %v353_v3 = vld [vmem:[%s2311_s12 + $0x18] sm:$0xff]  ;;  %vm430_vm1 = vcmask 7168   ;;  %p1309_p3 = scmp.ne.s32.totalorder %s1996_s24, 1 }
  0xb7   : > { %386 = vadd.xlane.f32.xlu1 %v352_v1  ;;  %382 = vadd.xlane.f32.xlu0 %v350_v2  ;;  %v351_v4 = vld [vmem:[%s2311_s12 + $0x8] sm:$0xff]  ;;  %v354_v6 = vld [vmem:[%s2311_s12 + $0x20] sm:$0xff]  ;;  %v357_v7 = vld [vmem:[%s2311_s12 + $0x38] sm:$0xff]  ;;  %v463_v18 = vmul.f32 %v350_v2, %v350_v2  ;;  %v466_v19 = vmul.f32 %v353_v3, %v353_v3  ;;  %v465_v20 = vmul.f32 %v352_v1, %v352_v1 }
  0xb8   : > { %v355_v5 = vld [vmem:[%s2311_s12 + $0x28] sm:$0xff]  ;;  %v356_v8 = vld [vmem:[%s2311_s12 + $0x30] sm:$0xff]  ;;  %v358_v10 = vld [vmem:[%s2311_s12 + $0x40] sm:$0xff]  ;;  %v464_v17 = vmul.f32 %v351_v4, %v351_v4  ;;  %v467_v22 = vmul.f32 %v354_v6, %v354_v6  ;;  %v470_v23 = vmul.f32 %v357_v7, %v357_v7 }
  0xb9   : > { %v359_v9 = vld [vmem:[%s2311_s12 + $0x48] sm:$0xff]  ;;  %v361_v11 = vld [vmem:[%s2311_s12 + $0x58] sm:$0xff]  ;;  %v360_v12 = vld [vmem:[%s2311_s12 + $0x50] sm:$0xff]  ;;  %v468_v21 = vmul.f32 %v355_v5, %v355_v5  ;;  %v469_v24 = vmul.f32 %v356_v8, %v356_v8  ;;  %v471_v26 = vmul.f32 %v358_v10, %v358_v10 }
  0xba   : > { %v363_v13 = vld [vmem:[%s2311_s12 + $0x68] sm:$0xff]  ;;  %v362_v14 = vld [vmem:[%s2311_s12 + $0x60] sm:$0xff]  ;;  %v365_v15 = vld [vmem:[%s2311_s12 + $0x78] sm:$0xff]  ;;  %v472_v25 = vmul.f32 %v359_v9, %v359_v9  ;;  %v474_v27 = vmul.f32 %v361_v11, %v361_v11  ;;  %v473_v28 = vmul.f32 %v360_v12, %v360_v12 }
  0xbb   : > { %388 = vadd.xlane.f32.xlu1 %v353_v3  ;;  %384 = vadd.xlane.f32.xlu0 %v351_v4  ;;  %v364_v16 = vld [vmem:[%s2311_s12 + $0x70] sm:$0xff]  ;;  %v476_v29 = vmul.f32 %v363_v13, %v363_v13  ;;  %v475_v30 = vmul.f32 %v362_v14, %v362_v14  ;;  %v478_v31 = vmul.f32 %v365_v15, %v365_v15  ;;  %v366_v34 = vld [vmem:[#allocation2] sm:$0xff]  ;;  %v369_v39 = vld [vmem:[#allocation2 + $0x18] sm:$0xff] }
  0xbc   : > { %v477_v32 = vmul.f32 %v364_v16, %v364_v16  ;;  %v368_v33 = vld [vmem:[#allocation2 + $0x10] sm:$0xff]  ;;  %v367_v40 = vld [vmem:[#allocation2 + $0x8] sm:$0xff]  ;;  %v370_v46 = vld [vmem:[#allocation2 + $0x20] sm:$0xff] }
  0xbd   : > { %v371_v45 = vld [vmem:[#allocation2 + $0x28] sm:$0xff]  ;;  %v373_v51 = vld [vmem:[#allocation2 + $0x38] sm:$0xff]  ;;  %v372_v52 = vld [vmem:[#allocation2 + $0x30] sm:$0xff] }
  0xbe   : > { %v375_v57 = vld [vmem:[#allocation2 + $0x48] sm:$0xff]  ;;  %v374_v58 = vld [vmem:[#allocation2 + $0x40] sm:$0xff]  ;;  %v377_v63 = vld [vmem:[#allocation2 + $0x58] sm:$0xff] }
  0xbf   : > { %392 = vadd.xlane.f32.xlu1 %v355_v5  ;;  %390 = vadd.xlane.f32.xlu0 %v354_v6  ;;  %v376_v0 = vld [vmem:[#allocation2 + $0x50] sm:$0xff]  ;;  %v379_v5 = vld [vmem:[#allocation2 + $0x68] sm:$0xff]  ;;  %v378_v6 = vld [vmem:[#allocation2 + $0x60] sm:$0xff] }
  0xc3   : > { %396 = vadd.xlane.f32.xlu1 %v357_v7  ;;  %394 = vadd.xlane.f32.xlu0 %v356_v8 }
  0xc7   : > { %400 = vadd.xlane.f32.xlu1 %v359_v9  ;;  %398 = vadd.xlane.f32.xlu0 %v358_v10 }
  0xcb   : > { %404 = vadd.xlane.f32.xlu1 %v361_v11  ;;  %402 = vadd.xlane.f32.xlu0 %v360_v12  ;;  %v381_v11 = vld [vmem:[#allocation2 + $0x78] sm:$0xff]  ;;  %v380_v12 = vld [vmem:[#allocation2 + $0x70] sm:$0xff] }
  0xcf   : > { %408 = vadd.xlane.f32.xlu1 %v363_v13  ;;  %406 = vadd.xlane.f32.xlu0 %v362_v14 }
  0xd3   : > { %412 = vadd.xlane.f32.xlu1 %v365_v15  ;;  %410 = vadd.xlane.f32.xlu0 %v364_v16 }
  0xd7   : > { %481 = vadd.xlane.f32.xlu1 %v464_v17  ;;  %479 = vadd.xlane.f32.xlu0 %v463_v18  ;;  %v448_v17 = vld [vmem:[#allocation3 + $0x8] sm:$0xff]  ;;  %v447_v18 = vld [vmem:[#allocation3] sm:$0xff] }
  0xdb   : > { %485 = vadd.xlane.f32.xlu1 %v466_v19  ;;  %483 = vadd.xlane.f32.xlu0 %v465_v20 }
  0xdf   : > { %489 = vadd.xlane.f32.xlu1 %v468_v21  ;;  %487 = vadd.xlane.f32.xlu0 %v467_v22 }
  0xe3   : > { %493 = vadd.xlane.f32.xlu1 %v470_v23  ;;  %491 = vadd.xlane.f32.xlu0 %v469_v24  ;;  %v450_v23 = vld [vmem:[#allocation3 + $0x18] sm:$0xff]  ;;  %v449_v24 = vld [vmem:[#allocation3 + $0x10] sm:$0xff] }
  0xe7   : > { %497 = vadd.xlane.f32.xlu1 %v472_v25  ;;  %495 = vadd.xlane.f32.xlu0 %v471_v26 }
  0xeb   : > { %501 = vadd.xlane.f32.xlu1 %v474_v27  ;;  %499 = vadd.xlane.f32.xlu0 %v473_v28 }
  0xef   : > { %505 = vadd.xlane.f32.xlu1 %v476_v29  ;;  %503 = vadd.xlane.f32.xlu0 %v475_v30  ;;  %v452_v29 = vld [vmem:[#allocation3 + $0x28] sm:$0xff]  ;;  %v451_v30 = vld [vmem:[#allocation3 + $0x20] sm:$0xff] }
  0xf3   : > { %509 = vadd.xlane.f32.xlu1 %v478_v31  ;;  %507 = vadd.xlane.f32.xlu0 %v477_v32 }
 0x144   : > { %v387_v35 = vpop.xlane.xlu1 %386  ;;  %v383_v36 = vpop.xlane.xlu0 %382 }
 0x145   : > { %v416_v37 = vadd.f32 %v387_v35, %v368_v33  ;;  %v414_v38 = vadd.f32 %v383_v36, %v366_v34  ;;  %v454_v35 = vld [vmem:[#allocation3 + $0x38] sm:$0xff]  ;;  %v453_v36 = vld [vmem:[#allocation3 + $0x30] sm:$0xff] }
 0x147   : > { %433 = vst.msk [vmem:[#allocation2 + $0x10] sm:$0xff] %vm430_vm1, %v416_v37  ;;  %431 = vst.msk [vmem:[#allocation2] sm:$0xff] %vm430_vm1, %v414_v38 }
 0x148   : > { %v389_v41 = vpop.xlane.xlu1 %388  ;;  %v385_v42 = vpop.xlane.xlu0 %384 }
 0x149   : > { %v417_v43 = vadd.f32 %v389_v41, %v369_v39  ;;  %v415_v44 = vadd.f32 %v385_v42, %v367_v40  ;;  %v456_v41 = vld [vmem:[#allocation3 + $0x48] sm:$0xff]  ;;  %v455_v42 = vld [vmem:[#allocation3 + $0x40] sm:$0xff] }
 0x14b   : > { %434 = vst.msk [vmem:[#allocation2 + $0x18] sm:$0xff] %vm430_vm1, %v417_v43  ;;  %432 = vst.msk [vmem:[#allocation2 + $0x8] sm:$0xff] %vm430_vm1, %v415_v44 }
 0x14c   : > { %v393_v47 = vpop.xlane.xlu1 %392  ;;  %v391_v48 = vpop.xlane.xlu0 %390 }
 0x14d   : > { %v419_v49 = vadd.f32 %v393_v47, %v371_v45  ;;  %v418_v50 = vadd.f32 %v391_v48, %v370_v46  ;;  %v458_v47 = vld [vmem:[#allocation3 + $0x58] sm:$0xff]  ;;  %v457_v48 = vld [vmem:[#allocation3 + $0x50] sm:$0xff] }
 0x14f   : > { %436 = vst.msk [vmem:[#allocation2 + $0x28] sm:$0xff] %vm430_vm1, %v419_v49  ;;  %435 = vst.msk [vmem:[#allocation2 + $0x20] sm:$0xff] %vm430_vm1, %v418_v50 }
 0x150   : > { %v397_v53 = vpop.xlane.xlu1 %396  ;;  %v395_v54 = vpop.xlane.xlu0 %394 }
 0x151   : > { %v421_v55 = vadd.f32 %v397_v53, %v373_v51  ;;  %v420_v56 = vadd.f32 %v395_v54, %v372_v52  ;;  %v460_v53 = vld [vmem:[#allocation3 + $0x68] sm:$0xff]  ;;  %v459_v54 = vld [vmem:[#allocation3 + $0x60] sm:$0xff] }
 0x153   : > { %438 = vst.msk [vmem:[#allocation2 + $0x38] sm:$0xff] %vm430_vm1, %v421_v55  ;;  %437 = vst.msk [vmem:[#allocation2 + $0x30] sm:$0xff] %vm430_vm1, %v420_v56 }
 0x154   : > { %v401_v59 = vpop.xlane.xlu1 %400  ;;  %v399_v60 = vpop.xlane.xlu0 %398 }
 0x155   : > { %v423_v61 = vadd.f32 %v401_v59, %v375_v57  ;;  %v422_v62 = vadd.f32 %v399_v60, %v374_v58  ;;  %v462_v59 = vld [vmem:[#allocation3 + $0x78] sm:$0xff]  ;;  %v461_v60 = vld [vmem:[#allocation3 + $0x70] sm:$0xff] }
 0x157   : > { %440 = vst.msk [vmem:[#allocation2 + $0x48] sm:$0xff] %vm430_vm1, %v423_v61  ;;  %439 = vst.msk [vmem:[#allocation2 + $0x40] sm:$0xff] %vm430_vm1, %v422_v62 }
 0x158   : > { %v405_v1 = vpop.xlane.xlu1 %404  ;;  %v403_v2 = vpop.xlane.xlu0 %402 }
 0x159   : > { %v425_v3 = vadd.f32 %v405_v1, %v377_v63  ;;  %v424_v4 = vadd.f32 %v403_v2, %v376_v0  ;;  %v563_v1 = vld [vmem:[#allocation2] sm:$0xff] (!%p1309_p3)  ;;  %v564_v2 = vld [vmem:[#allocation2 + $0x8] sm:$0xff] (!%p1309_p3) }
 0x15b   : > { %442 = vst.msk [vmem:[#allocation2 + $0x58] sm:$0xff] %vm430_vm1, %v425_v3  ;;  %441 = vst.msk [vmem:[#allocation2 + $0x50] sm:$0xff] %vm430_vm1, %v424_v4  ;;  %v1496_v4 = vpack.c.bf16 (!%p1309_p3), %v564_v2, %v563_v1 }
 0x15c   : > { %v409_v7 = vpop.xlane.xlu1 %408  ;;  %v407_v8 = vpop.xlane.xlu0 %406 }
 0x15d   : > { %v427_v9 = vadd.f32 %v409_v7, %v379_v5  ;;  %v426_v10 = vadd.f32 %v407_v8, %v378_v6  ;;  %v565_v6 = vld [vmem:[#allocation2 + $0x10] sm:$0xff] (!%p1309_p3)  ;;  %v566_v7 = vld [vmem:[#allocation2 + $0x18] sm:$0xff] (!%p1309_p3)  ;;  %1497 = vmatprep.subr.bf16.mxu0 (!%p1309_p3), %v1496_v4 }
 0x15e   : > { %1499 = vmatpush3.bf16.msra.mxu0 (!%p1309_p3), %v1496_v4 }
 0x15f   : > { %444 = vst.msk [vmem:[#allocation2 + $0x68] sm:$0xff] %vm430_vm1, %v427_v9  ;;  %443 = vst.msk [vmem:[#allocation2 + $0x60] sm:$0xff] %vm430_vm1, %v426_v10  ;;  %v1500_v9 = vpack.c.bf16 (!%p1309_p3), %v566_v7, %v565_v6 }
 0x160   : > { %v413_v13 = vpop.xlane.xlu1 %412  ;;  %v411_v14 = vpop.xlane.xlu0 %410 }
 0x161   : > { %v429_v15 = vadd.f32 %v413_v13, %v381_v11  ;;  %v428_v16 = vadd.f32 %v411_v14, %v380_v12  ;;  %v567_v12 = vld [vmem:[#allocation2 + $0x20] sm:$0xff] (!%p1309_p3)  ;;  %v568_v14 = vld [vmem:[#allocation2 + $0x28] sm:$0xff] (!%p1309_p3)  ;;  %1501 = vmatprep.subr.bf16.mxu0 (!%p1309_p3), %v1500_v9 }
 0x162   : > { %1503 = vmatpush3.bf16.msra.mxu0 (!%p1309_p3), %v1500_v9 }
 0x163   : > { %446 = vst.msk [vmem:[#allocation2 + $0x78] sm:$0xff] %vm430_vm1, %v429_v15  ;;  %445 = vst.msk [vmem:[#allocation2 + $0x70] sm:$0xff] %vm430_vm1, %v428_v16 }
 0x164   : > { %v482_v19 = vpop.xlane.xlu1 %481  ;;  %v480_v20 = vpop.xlane.xlu0 %479 }
 0x165   : > { %v512_v21 = vadd.f32 %v482_v19, %v448_v17  ;;  %v511_v22 = vadd.f32 %v480_v20, %v447_v18  ;;  %v1504_v17 = vpack.c.bf16 (!%p1309_p3), %v568_v14, %v567_v12  ;;  %v569_v19 = vld [vmem:[#allocation2 + $0x30] sm:$0xff] (!%p1309_p3)  ;;  %v570_v20 = vld [vmem:[#allocation2 + $0x38] sm:$0xff] (!%p1309_p3) }
 0x167   : > { %528 = vst.msk [vmem:[#allocation3 + $0x8] sm:$0xff] %vm430_vm1, %v512_v21  ;;  %527 = vst.msk [vmem:[#allocation3] sm:$0xff] %vm430_vm1, %v511_v22  ;;  %1505 = vmatprep.subr.bf16.mxu0 (!%p1309_p3), %v1504_v17 }
 0x168   : > { %v486_v25 = vpop.xlane.xlu1 %485  ;;  %v484_v26 = vpop.xlane.xlu0 %483  ;;  %1507 = vmatpush3.bf16.msra.mxu0 (!%p1309_p3), %v1504_v17 }
 0x169   : > { %v514_v27 = vadd.f32 %v486_v25, %v450_v23  ;;  %v513_v28 = vadd.f32 %v484_v26, %v449_v24  ;;  %v1508_v23 = vpack.c.bf16 (!%p1309_p3), %v570_v20, %v569_v19  ;;  %v571_v25 = vld [vmem:[#allocation2 + $0x40] sm:$0xff] (!%p1309_p3)  ;;  %v572_v26 = vld [vmem:[#allocation2 + $0x48] sm:$0xff] (!%p1309_p3) }
 0x16b   : > { %530 = vst.msk [vmem:[#allocation3 + $0x18] sm:$0xff] %vm430_vm1, %v514_v27  ;;  %529 = vst.msk [vmem:[#allocation3 + $0x10] sm:$0xff] %vm430_vm1, %v513_v28  ;;  %v547_v27 = vld [vmem:[#allocation10] sm:$0xff] (!%p1309_p3)  ;;  %1509 = vmatprep.subr.bf16.mxu0 (!%p1309_p3), %v1508_v23 }
 0x16c   : > { %v490_v31 = vpop.xlane.xlu1 %489  ;;  %v488_v32 = vpop.xlane.xlu0 %487  ;;  %1416 = vmatprep.mubr.f32.mxu0 (!%p1309_p3), %v547_v27  ;;  %1472 = vmatprep.mubr.f32.mxu1 (!%p1309_p3), %v547_v27 }
 0x16d   : > { %v516_v33 = vadd.f32 %v490_v31, %v452_v29  ;;  %v515_v34 = vadd.f32 %v488_v32, %v451_v30  ;;  %v1512_v30 = vpack.c.bf16 (!%p1309_p3), %v572_v26, %v571_v25  ;;  %v573_v32 = vld [vmem:[#allocation2 + $0x50] sm:$0xff] (!%p1309_p3)  ;;  %1511 = vmatpush3.bf16.msra.mxu0 (!%p1309_p3), %v1508_v23 }
 0x16e   : > { %v740_v3 = vld [vmem:[#allocation3] sm:$0xff] (!%p1309_p3)  ;;  %v741_v5 = vld [vmem:[#allocation3 + $0x8] sm:$0xff] (!%p1309_p3) }
 0x16f   : > { %532 = vst.msk [vmem:[#allocation3 + $0x28] sm:$0xff] %vm430_vm1, %v516_v33  ;;  %531 = vst.msk [vmem:[#allocation3 + $0x20] sm:$0xff] %vm430_vm1, %v515_v34  ;;  %v1528_v8 = vpack.c.bf16 (!%p1309_p3), %v741_v5, %v740_v3  ;;  %v574_v33 = vld [vmem:[#allocation2 + $0x58] sm:$0xff] (!%p1309_p3)  ;;  %1513 = vmatprep.subr.bf16.mxu0 (!%p1309_p3), %v1512_v30 }
 0x170   : > { %v494_v37 = vpop.xlane.xlu1 %493  ;;  %v492_v38 = vpop.xlane.xlu0 %491 }
 0x171   : > { %v518_v39 = vadd.f32 %v494_v37, %v454_v35  ;;  %v517_v40 = vadd.f32 %v492_v38, %v453_v36  ;;  %1529 = vmatprep.subr.bf16.mxu1 (!%p1309_p3), %v1528_v8  ;;  %v1516_v36 = vpack.c.bf16 (!%p1309_p3), %v574_v33, %v573_v32  ;;  %v575_v38 = vld [vmem:[#allocation2 + $0x60] sm:$0xff] (!%p1309_p3)  ;;  %1515 = vmatpush3.bf16.msra.mxu0 (!%p1309_p3), %v1512_v30 }
 0x172   : > { %v742_v10 = vld [vmem:[#allocation3 + $0x10] sm:$0xff] (!%p1309_p3)  ;;  %v743_v11 = vld [vmem:[#allocation3 + $0x18] sm:$0xff] (!%p1309_p3)  ;;  %1531 = vmatpush3.bf16.msra.mxu1 (!%p1309_p3), %v1528_v8 }
 0x173   : > { %534 = vst.msk [vmem:[#allocation3 + $0x38] sm:$0xff] %vm430_vm1, %v518_v39  ;;  %533 = vst.msk [vmem:[#allocation3 + $0x30] sm:$0xff] %vm430_vm1, %v517_v40  ;;  %v1532_v13 = vpack.c.bf16 (!%p1309_p3), %v743_v11, %v742_v10  ;;  %v576_v39 = vld [vmem:[#allocation2 + $0x68] sm:$0xff] (!%p1309_p3)  ;;  %1517 = vmatprep.subr.bf16.mxu0 (!%p1309_p3), %v1516_v36 }
 0x174   : > { %v498_v43 = vpop.xlane.xlu1 %497  ;;  %v496_v44 = vpop.xlane.xlu0 %495 }
 0x175   : > { %v520_v45 = vadd.f32 %v498_v43, %v456_v41  ;;  %v519_v46 = vadd.f32 %v496_v44, %v455_v42  ;;  %1533 = vmatprep.subr.bf16.mxu1 (!%p1309_p3), %v1532_v13  ;;  %v1520_v42 = vpack.c.bf16 (!%p1309_p3), %v576_v39, %v575_v38  ;;  %v577_v44 = vld [vmem:[#allocation2 + $0x70] sm:$0xff] (!%p1309_p3)  ;;  %1519 = vmatpush3.bf16.msra.mxu0 (!%p1309_p3), %v1516_v36 }
 0x176   : > { %v744_v15 = vld [vmem:[#allocation3 + $0x20] sm:$0xff] (!%p1309_p3)  ;;  %v745_v16 = vld [vmem:[#allocation3 + $0x28] sm:$0xff] (!%p1309_p3)  ;;  %1535 = vmatpush3.bf16.msra.mxu1 (!%p1309_p3), %v1532_v13 }
 0x177   : > { %536 = vst.msk [vmem:[#allocation3 + $0x48] sm:$0xff] %vm430_vm1, %v520_v45  ;;  %535 = vst.msk [vmem:[#allocation3 + $0x40] sm:$0xff] %vm430_vm1, %v519_v46  ;;  %v1536_v18 = vpack.c.bf16 (!%p1309_p3), %v745_v16, %v744_v15  ;;  %v578_v45 = vld [vmem:[#allocation2 + $0x78] sm:$0xff] (!%p1309_p3)  ;;  %1521 = vmatprep.subr.bf16.mxu0 (!%p1309_p3), %v1520_v42 }
 0x178   : > { %v502_v49 = vpop.xlane.xlu1 %501  ;;  %v500_v50 = vpop.xlane.xlu0 %499 }
 0x179   : > { %v522_v51 = vadd.f32 %v502_v49, %v458_v47  ;;  %v521_v52 = vadd.f32 %v500_v50, %v457_v48  ;;  %1537 = vmatprep.subr.bf16.mxu1 (!%p1309_p3), %v1536_v18  ;;  %v1524_v48 = vpack.c.bf16 (!%p1309_p3), %v578_v45, %v577_v44  ;;  %1523 = vmatpush3.bf16.msra.mxu0 (!%p1309_p3), %v1520_v42  ;;  %v548_v50 = vld [vmem:[#allocation10 + $0x8] sm:$0xff] (!%p1309_p3) }
 0x17a   : > { %v746_v21 = vld [vmem:[#allocation3 + $0x30] sm:$0xff] (!%p1309_p3)  ;;  %v747_v22 = vld [vmem:[#allocation3 + $0x38] sm:$0xff] (!%p1309_p3)  ;;  %1539 = vmatpush3.bf16.msra.mxu1 (!%p1309_p3), %v1536_v18 }
 0x17b   : > { %538 = vst.msk [vmem:[#allocation3 + $0x58] sm:$0xff] %vm430_vm1, %v522_v51  ;;  %537 = vst.msk [vmem:[#allocation3 + $0x50] sm:$0xff] %vm430_vm1, %v521_v52  ;;  %v1540_v24 = vpack.c.bf16 (!%p1309_p3), %v747_v22, %v746_v21  ;;  %1525 = vmatprep.subr.bf16.mxu0 (!%p1309_p3), %v1524_v48  ;;  %v549_v51 = vld [vmem:[#allocation10 + $0x10] sm:$0xff] (!%p1309_p3)  ;;  %v550_v52 = vld [vmem:[#allocation10 + $0x18] sm:$0xff] (!%p1309_p3) }
 0x17c   : > { %v506_v55 = vpop.xlane.xlu1 %505  ;;  %v504_v56 = vpop.xlane.xlu0 %503 }
 0x17d   : > { %v524_v57 = vadd.f32 %v506_v55, %v460_v53  ;;  %v523_v58 = vadd.f32 %v504_v56, %v459_v54  ;;  %546 = sbr.rel (%p1309_p3) target bundleno = 671 (0x29f), region = 60  ;;  %1541 = vmatprep.subr.bf16.mxu1 (!%p1309_p3), %v1540_v24  ;;  %1527 = vmatpush3.bf16.msra.mxu0 (!%p1309_p3), %v1524_v48  ;;  %v551_v53 = vld [vmem:[#allocation10 + $0x20] sm:$0xff] (!%p1309_p3)  ;;  %v552_v54 = vld [vmem:[#allocation10 + $0x28] sm:$0xff] (!%p1309_p3)  ;;  %v553_v55 = vld [vmem:[#allocation10 + $0x30] sm:$0xff] (!%p1309_p3) }
 0x17e   : > { %v748_v28 = vld [vmem:[#allocation3 + $0x40] sm:$0xff] (!%p1309_p3)  ;;  %v749_v29 = vld [vmem:[#allocation3 + $0x48] sm:$0xff] (!%p1309_p3)  ;;  %1543 = vmatpush3.bf16.msra.mxu1 (!%p1309_p3), %v1540_v24  ;;  %v554_v56 = vld [vmem:[#allocation10 + $0x38] sm:$0xff] (!%p1309_p3) }
 0x17f   : > { %540 = vst.msk [vmem:[#allocation3 + $0x68] sm:$0xff] %vm430_vm1, %v524_v57  ;;  %539 = vst.msk [vmem:[#allocation3 + $0x60] sm:$0xff] %vm430_vm1, %v523_v58  ;;  %v1544_v31 = vpack.c.bf16 (!%p1309_p3), %v749_v29, %v748_v28  ;;  %v555_v57 = vld [vmem:[#allocation10 + $0x40] sm:$0xff] (!%p1309_p3)  ;;  %v556_v58 = vld [vmem:[#allocation10 + $0x48] sm:$0xff] (!%p1309_p3) }
 0x180   : > { %v510_v61 = vpop.xlane.xlu1 %509  ;;  %v508_v62 = vpop.xlane.xlu0 %507  ;;  %1417 = vmatmul.mubr.f32.vlgmr.msra.gmra.mrb[0].mxu0 (!%p1309_p3), %v548_v50 }
 0x181   : > { %v526_v63 = vadd.f32 %v510_v61, %v462_v59  ;;  %v525_v0 = vadd.f32 %v508_v62, %v461_v60  ;;  %1545 = vmatprep.subr.bf16.mxu1 (!%p1309_p3), %v1544_v31  ;;  %1419 = vmatprep.mubr.f32.mxu0 (!%p1309_p3), %v549_v51  ;;  %v557_v59 = vld [vmem:[#allocation10 + $0x50] sm:$0xff] (!%p1309_p3)  ;;  %v558_v60 = vld [vmem:[#allocation10 + $0x58] sm:$0xff] (!%p1309_p3)  ;;  %v559_v61 = vld [vmem:[#allocation10 + $0x60] sm:$0xff] (!%p1309_p3) }
 0x182   : > { %v750_v34 = vld [vmem:[#allocation3 + $0x50] sm:$0xff] (!%p1309_p3)  ;;  %v751_v35 = vld [vmem:[#allocation3 + $0x58] sm:$0xff] (!%p1309_p3)  ;;  %1547 = vmatpush3.bf16.msra.mxu1 (!%p1309_p3), %v1544_v31  ;;  %v560_v62 = vld [vmem:[#allocation10 + $0x68] sm:$0xff] (!%p1309_p3) }
 0x183   : > { %542 = vst.msk [vmem:[#allocation3 + $0x78] sm:$0xff] %vm430_vm1, %v526_v63  ;;  %541 = vst.msk [vmem:[#allocation3 + $0x70] sm:$0xff] %vm430_vm1, %v525_v0  ;;  %v1548_v37 = vpack.c.bf16 (!%p1309_p3), %v751_v35, %v750_v34  ;;  %v561_v63 = vld [vmem:[#allocation10 + $0x70] sm:$0xff] (!%p1309_p3)  ;;  %v562_v0 = vld [vmem:[#allocation10 + $0x78] sm:$0xff] (!%p1309_p3) }
 0x184   : > { %1420 = vmatmul.mubr.f32.gmra.mrb[2].mxu0 %v550_v52 }
 0x185   : > { %1549 = vmatprep.subr.bf16.mxu1 %v1548_v37  ;;  %1422 = vmatprep.mubr.f32.mxu0 %v551_v53 }
 0x186   : > { %v752_v40 = vld [vmem:[#allocation3 + $0x60] sm:$0xff]  ;;  %v753_v41 = vld [vmem:[#allocation3 + $0x68] sm:$0xff]  ;;  %1551 = vmatpush3.bf16.msra.mxu1 %v1548_v37 }
 0x187   : > { %v1552_v43 = vpack.c.bf16 %v753_v41, %v752_v40 }
 0x188   : > { %1423 = vmatmul.mubr.f32.gmra.mrb[4].mxu0 %v552_v54 }
 0x189   : > { %1553 = vmatprep.subr.bf16.mxu1 %v1552_v43  ;;  %1425 = vmatprep.mubr.f32.mxu0 %v553_v55 }
 0x18a   : > { %v754_v46 = vld [vmem:[#allocation3 + $0x70] sm:$0xff]  ;;  %v755_v47 = vld [vmem:[#allocation3 + $0x78] sm:$0xff]  ;;  %1555 = vmatpush3.bf16.msra.mxu1 %v1552_v43 }
 0x18b   : > { %v1556_v49 = vpack.c.bf16 %v755_v47, %v754_v46 }
 0x18c   : > { %1426 = vmatmul.mubr.f32.gmra.mrb[6].mxu0 %v554_v56 }
 0x18d   : > { %1557 = vmatprep.subr.bf16.mxu1 %v1556_v49  ;;  %1428 = vmatprep.mubr.f32.mxu0 %v555_v57 }
 0x18e   : > { %1559 = vmatpush3.bf16.msra.mxu1 %v1556_v49 }
 0x190   : > { %1429 = vmatmul.mubr.f32.gmra.mrb[8].mxu0 %v556_v58 }
 0x191   : > { %1473 = vmatmul.mubr.f32.vlgmr.msra.gmra.mrb[0].mxu1 %v548_v50  ;;  %1431 = vmatprep.mubr.f32.mxu0 %v557_v59 }
 0x192   : > { %1475 = vmatprep.mubr.f32.mxu1 %v549_v51 }
 0x194   : > { %1432 = vmatmul.mubr.f32.gmra.mrb[10].mxu0 %v558_v60 }
 0x195   : > { %1476 = vmatmul.mubr.f32.gmra.mrb[2].mxu1 %v550_v52  ;;  %1434 = vmatprep.mubr.f32.mxu0 %v559_v61 }
 0x196   : > { %1478 = vmatprep.mubr.f32.mxu1 %v551_v53 }
 0x198   : > { %1435 = vmatmul.mubr.f32.gmra.mrb[12].mxu0 %v560_v62 }
 0x199   : > { %1479 = vmatmul.mubr.f32.gmra.mrb[4].mxu1 %v552_v54  ;;  %1437 = vmatprep.mubr.f32.mxu0 %v561_v63 }
 0x19a   : > { %1481 = vmatprep.mubr.f32.mxu1 %v553_v55 }
 0x19c   : > { %1438 = vmatmul.mubr.f32.gmra.mrb[14].mxu0 %v562_v0 }
 0x19d   : > { %1482 = vmatmul.mubr.f32.gmra.mrb[6].mxu1 %v554_v56 }
 0x19e   : > { %1484 = vmatprep.mubr.f32.mxu1 %v555_v57 }
 0x1a1   : > { %1485 = vmatmul.mubr.f32.gmra.mrb[8].mxu1 %v556_v58 }
 0x1a2   : > { %1487 = vmatprep.mubr.f32.mxu1 %v557_v59 }
 0x1a5   : > { %1488 = vmatmul.mubr.f32.gmra.mrb[10].mxu1 %v558_v60 }
 0x1a6   : > { %1490 = vmatprep.mubr.f32.mxu1 %v559_v61 }
 0x1a9   : > { %1491 = vmatmul.mubr.f32.gmra.mrb[12].mxu1 %v560_v62 }
 0x1aa   : > { %1493 = vmatprep.mubr.f32.mxu1 %v561_v63 }
 0x1ad   : > { %1494 = vmatmul.mubr.f32.gmra.mrb[14].mxu1 %v562_v0 }
 0x253   : > { %v1418_v1 = vpop.f32.mrb[0].mxu0 }
 0x254   : > { %v2415_v2 = vmul.f32 0.0009765625, %v1418_v1  ;;  %v645_v3 = vpop.f32.mrb[1].mxu0 }
 0x255   : > { %v2417_v5 = vmul.f32 0.0009765625, %v645_v3 }
 0x256   : > { %v918_v8 = vmul.f32 %v2415_v2, %v2415_v2 }
 0x257   : > { %v917_v10 = vmul.f32 %v2417_v5, %v2417_v5  ;;  %v1421_v11 = vpop.f32.mrb[2].mxu0 }
 0x258   : > { %v2423_v13 = vmul.f32 0.0009765625, %v1421_v11  ;;  %v655_v14 = vpop.f32.mrb[3].mxu0 }
 0x259   : > { %v2425_v17 = vmul.f32 0.0009765625, %v655_v14 }
 0x25a   : > { %v920_v21 = vmul.f32 %v2423_v13, %v2423_v13 }
 0x25b   : > { %v919_v24 = vmul.f32 %v2425_v17, %v2425_v17  ;;  %v1424_v25 = vpop.f32.mrb[4].mxu0 }
 0x25c   : > { %v2431_v28 = vmul.f32 0.0009765625, %v1424_v25  ;;  %v665_v29 = vpop.f32.mrb[5].mxu0 }
 0x25d   : > { %v2433_v33 = vmul.f32 0.0009765625, %v665_v29  ;;  %v1046_v29 = vld [vmem:[#allocation9 + $0x8] sm:$0xff] }
 0x25e   : > { %v922_v37 = vmul.f32 %v2431_v28, %v2431_v28 }
 0x25f   : > { %v921_v40 = vmul.f32 %v2433_v33, %v2433_v33  ;;  %v1427_v41 = vpop.f32.mrb[6].mxu0 }
 0x260   : > { %v2439_v44 = vmul.f32 0.0009765625, %v1427_v41  ;;  %v675_v45 = vpop.f32.mrb[7].mxu0 }
 0x261   : > { %v2441_v49 = vmul.f32 0.0009765625, %v675_v45 }
 0x262   : > { %v924_v53 = vmul.f32 %v2439_v44, %v2439_v44 }
 0x263   : > { %v923_v56 = vmul.f32 %v2441_v49, %v2441_v49  ;;  %v1430_v57 = vpop.f32.mrb[8].mxu0 }
 0x264   : > { %v1474_v4 = vpop.f32.mrb[0].mxu1  ;;  %v2447_v60 = vmul.f32 0.0009765625, %v1430_v57  ;;  %v685_v61 = vpop.f32.mrb[9].mxu0 }
 0x265   : > { %v902_v6 = vmul.f32 0.0009765625, %v1474_v4  ;;  %v822_v7 = vpop.f32.mrb[1].mxu1  ;;  %v2449_v1 = vmul.f32 0.0009765625, %v685_v61  ;;  %v1047_v61 = vld [vmem:[#allocation9 + $0x10] sm:$0xff] }
 0x266   : > { %v901_v9 = vmul.f32 0.0009765625, %v822_v7 }
 0x267   : > { %v934_v12 = vsub.f32 %v902_v6, %v918_v8  ;;  %v998_v6 = vld [vmem:[#allocation7 + $0x8] sm:$0xff]  ;;  %v926_v8 = vmul.f32 %v2447_v60, %v2447_v60  ;;  %v1433_v14 = vpop.f32.mrb[10].mxu0 }
 0x268   : > { %v1477_v15 = vpop.f32.mrb[2].mxu1  ;;  %v933_v16 = vsub.f32 %v901_v9, %v917_v10  ;;  %v997_v10 = vld [vmem:[#allocation7] sm:$0xff] }
 0x269   : > { %v904_v18 = vmul.f32 0.0009765625, %v1477_v15  ;;  %v832_v19 = vpop.f32.mrb[3].mxu1  ;;  %v950_v20 = vmax.f32 %v934_v12, 0.0  ;;  %v925_v12 = vmul.f32 %v2449_v1, %v2449_v1 }
 0x26a   : > { %v903_v22 = vmul.f32 0.0009765625, %v832_v19  ;;  %v949_v23 = vmax.f32 %v933_v16, 0.0  ;;  %v2455_v19 = vmul.f32 0.0009765625, %v1433_v14 }
 0x26b   : > { %v966_v26 = vadd.f32 1e-05, %v950_v20  ;;  %v936_v27 = vsub.f32 %v904_v18, %v920_v21  ;;  %v695_v20 = vpop.f32.mrb[11].mxu0 }
 0x26c   : > { %v1480_v30 = vpop.f32.mrb[4].mxu1  ;;  %v965_v31 = vadd.f32 1e-05, %v949_v23  ;;  %v935_v32 = vsub.f32 %v903_v22, %v919_v24 }
 0x26d   : > { %v906_v34 = vmul.f32 0.0009765625, %v1480_v30  ;;  %v842_v35 = vpop.f32.mrb[5].mxu1  ;;  %1704 = vrsqrt.f32 %v966_v26  ;;  %v952_v36 = vmax.f32 %v936_v27, 0.0  ;;  %v2457_v26 = vmul.f32 0.0009765625, %v695_v20 }
 0x26e   : > { %v905_v38 = vmul.f32 0.0009765625, %v842_v35  ;;  %1706 = vrsqrt.f32 %v965_v31  ;;  %v951_v39 = vmax.f32 %v935_v32, 0.0  ;;  %v1000_v31 = vld [vmem:[#allocation7 + $0x18] sm:$0xff] }
 0x26f   : > { %v968_v42 = vadd.f32 1e-05, %v952_v36  ;;  %v938_v43 = vsub.f32 %v906_v34, %v922_v37  ;;  %v928_v34 = vmul.f32 %v2455_v19, %v2455_v19  ;;  %v1045_v36 = vld [vmem:[#allocation9] sm:$0xff]  ;;  %v999_v37 = vld [vmem:[#allocation7 + $0x10] sm:$0xff] }
 0x270   : > { %v1483_v46 = vpop.f32.mrb[6].mxu1  ;;  %v967_v47 = vadd.f32 1e-05, %v951_v39  ;;  %v937_v48 = vsub.f32 %v905_v38, %v921_v40  ;;  %v927_v39 = vmul.f32 %v2457_v26, %v2457_v26  ;;  %v1436_v40 = vpop.f32.mrb[12].mxu0 }
 0x271   : > { %v908_v50 = vmul.f32 0.0009765625, %v1483_v46  ;;  %v852_v51 = vpop.f32.mrb[7].mxu1  ;;  %1708 = vrsqrt.f32 %v968_v42  ;;  %v954_v52 = vmax.f32 %v938_v43, 0.0 }
 0x272   : > { %v907_v54 = vmul.f32 0.0009765625, %v852_v51  ;;  %1710 = vrsqrt.f32 %v967_v47  ;;  %v953_v55 = vmax.f32 %v937_v48, 0.0  ;;  %v705_v47 = vpop.f32.mrb[13].mxu0 }
 0x273   : > { %v970_v58 = vadd.f32 1e-05, %v954_v52  ;;  %v940_v59 = vsub.f32 %v908_v50, %v924_v53  ;;  %v2469_v53 = vmul.f32 0.0009765625, %v1436_v40 }
 0x274   : > { %v1486_v62 = vpop.f32.mrb[8].mxu1  ;;  %v969_v63 = vadd.f32 1e-05, %v953_v55  ;;  %v939_v0 = vsub.f32 %v907_v54, %v923_v56  ;;  %v1048_v56 = vld [vmem:[#allocation9 + $0x18] sm:$0xff] }
 0x275   : > { %v910_v3 = vmul.f32 0.0009765625, %v1486_v62  ;;  %v862_v4 = vpop.f32.mrb[9].mxu1  ;;  %1712 = vrsqrt.f32 %v970_v58  ;;  %v956_v7 = vmax.f32 %v940_v59, 0.0  ;;  %v1001_v62 = vld [vmem:[#allocation7 + $0x20] sm:$0xff] }
 0x276   : > { %v909_v9 = vmul.f32 0.0009765625, %v862_v4  ;;  %1714 = vrsqrt.f32 %v969_v63  ;;  %v955_v11 = vmax.f32 %v939_v0, 0.0  ;;  %v930_v0 = vmul.f32 %v2469_v53, %v2469_v53 }
 0x277   : > { %v1705_v15 = vpop.eup %1704  ;;  %v972_v16 = vadd.f32 1e-05, %v956_v7  ;;  %v942_v18 = vsub.f32 %v910_v3, %v926_v8  ;;  %v1439_v3 = vpop.f32.mrb[14].mxu0  ;;  %v2483_v8 = vmul.f32 0.0009765625, %v705_v47 }
 0x278   : > { %v1489_v21 = vpop.f32.mrb[10].mxu1  ;;  %v1707_v22 = vpop.eup %1706  ;;  %v1014_v23 = vmul.f32 %v1705_v15, %v998_v6  ;;  %v971_v24 = vadd.f32 1e-05, %v955_v11  ;;  %v941_v25 = vsub.f32 %v909_v9, %v925_v12 }
 0x279   : > { %v872_v27 = vpop.f32.mrb[11].mxu1  ;;  %v1013_v30 = vmul.f32 %v1707_v22, %v997_v10  ;;  %1716 = vrsqrt.f32 %v972_v16  ;;  %v958_v32 = vmax.f32 %v942_v18, 0.0  ;;  %v912_v45 = vmul.f32 0.0009765625, %v1489_v21  ;;  %v715_v9 = vpop.f32.mrb[15].mxu0  ;;  %v1050_v21 = vld [vmem:[#allocation9 + $0x28] sm:$0xff] }
 0x27a   : > { %1030 = vst.msk [vmem:[%s2329_s18 + $0x8] sm:$0xff] %vm430_vm1, %v1014_v23  ;;  %v1062_v35 = vmul.f32 %v1014_v23, %v2415_v2  ;;  %1718 = vrsqrt.f32 %v971_v24  ;;  %v957_v38 = vmax.f32 %v941_v25, 0.0  ;;  %v911_v46 = vmul.f32 0.0009765625, %v872_v27  ;;  %v1049_v27 = vld [vmem:[#allocation9 + $0x20] sm:$0xff] }
 0x27b   : > { %v1709_v41 = vpop.eup %1708  ;;  %1029 = vst.msk [vmem:[%s2329_s18] sm:$0xff] %vm430_vm1, %v1013_v30  ;;  %v1061_v42 = vmul.f32 %v1013_v30, %v2417_v5  ;;  %v974_v43 = vadd.f32 1e-05, %v958_v32  ;;  %v1002_v5 = vld [vmem:[#allocation7 + $0x28] sm:$0xff]  ;;  %v944_v58 = vsub.f32 %v912_v45, %v928_v34  ;;  %v929_v24 = vmul.f32 %v2483_v8, %v2483_v8 }
 0x27c   : > { %v1492_v2 = vpop.f32.mrb[12].mxu1  ;;  %v1711_v48 = vpop.eup %1710  ;;  %v1078_v50 = vsub.f32 %v1046_v29, %v1062_v35  ;;  %v1016_v51 = vmul.f32 %v1709_v41, %v1000_v31  ;;  %v973_v52 = vadd.f32 1e-05, %v957_v38  ;;  %v943_v63 = vsub.f32 %v911_v46, %v927_v39  ;;  %v1003_v29 = vld [vmem:[#allocation7 + $0x30] sm:$0xff]  ;;  %v1006_v45 = vld [vmem:[#allocation7 + $0x48] sm:$0xff] }
 0x27d   : > { %v882_v54 = vpop.f32.mrb[13].mxu1  ;;  %v1077_v55 = vsub.f32 %v1045_v36, %v1061_v42  ;;  %v1015_v57 = vmul.f32 %v1711_v48, %v999_v37  ;;  %1720 = vrsqrt.f32 %v974_v43  ;;  %v960_v7 = vmax.f32 %v944_v58, 0.0  ;;  %v1052_v42 = vld [vmem:[#allocation9 + $0x38] sm:$0xff]  ;;  %v1005_v48 = vld [vmem:[#allocation7 + $0x40] sm:$0xff] }
 0x27e   : > { %1094 = vst.msk [vmem:[%s2331_s10 + $0x8] sm:$0xff] %vm430_vm1, %v1078_v50  ;;  %1032 = vst.msk [vmem:[%s2329_s18 + $0x18] sm:$0xff] %vm430_vm1, %v1016_v51  ;;  %v1064_v59 = vmul.f32 %v1016_v51, %v2423_v13  ;;  %1722 = vrsqrt.f32 %v973_v52  ;;  %v914_v13 = vmul.f32 0.0009765625, %v1492_v2  ;;  %v959_v15 = vmax.f32 %v943_v63, 0.0  ;;  %v1051_v2 = vld [vmem:[#allocation9 + $0x30] sm:$0xff] }
 0x27f   : > { %v1713_v4 = vpop.eup %1712  ;;  %1093 = vst.msk [vmem:[%s2331_s10] sm:$0xff] %vm430_vm1, %v1077_v55  ;;  %1031 = vst.msk [vmem:[%s2329_s18 + $0x10] sm:$0xff] %vm430_vm1, %v1015_v57  ;;  %v1063_v6 = vmul.f32 %v1015_v57, %v2425_v17  ;;  %v913_v16 = vmul.f32 0.0009765625, %v882_v54  ;;  %v1004_v17 = vld [vmem:[#allocation7 + $0x38] sm:$0xff]  ;;  %v976_v23 = vadd.f32 1e-05, %v960_v7 }
 0x280   : > { %v1495_v10 = vpop.f32.mrb[14].mxu1  ;;  %v1715_v11 = vpop.eup %1714  ;;  %v1080_v12 = vsub.f32 %v1048_v56, %v1064_v59  ;;  %v1018_v14 = vmul.f32 %v1713_v4, %v1002_v5  ;;  %v975_v30 = vadd.f32 1e-05, %v959_v15  ;;  %v946_v31 = vsub.f32 %v914_v13, %v930_v0  ;;  %v1008_v7 = vld [vmem:[#allocation7 + $0x58] sm:$0xff] }
 0x281   : > { %v892_v18 = vpop.f32.mrb[15].mxu1  ;;  %v1079_v20 = vsub.f32 %v1047_v61, %v1063_v6  ;;  %v1017_v22 = vmul.f32 %v1715_v11, %v1001_v62  ;;  %v2492_v32 = vmul.f32 0.0009765625, %v1439_v3  ;;  %1724 = vrsqrt.f32 %v976_v23  ;;  %v1054_v62 = vld [vmem:[#allocation9 + $0x48] sm:$0xff]  ;;  %v1053_v3 = vld [vmem:[#allocation9 + $0x40] sm:$0xff] }
 0x282   : > { %1096 = vst.msk [vmem:[%s2331_s10 + $0x18] sm:$0xff] %vm430_vm1, %v1080_v12  ;;  %1034 = vst.msk [vmem:[%s2329_s18 + $0x28] sm:$0xff] %vm430_vm1, %v1018_v14  ;;  %v1066_v25 = vmul.f32 %v1018_v14, %v2431_v28  ;;  %v945_v36 = vsub.f32 %v913_v16, %v929_v24  ;;  %v2499_v37 = vmul.f32 0.0009765625, %v715_v9  ;;  %1726 = vrsqrt.f32 %v975_v30  ;;  %v1009_v23 = vld [vmem:[#allocation7 + $0x60] sm:$0xff] }
 0x283   : > { %v1717_v34 = vpop.eup %1716  ;;  %1095 = vst.msk [vmem:[%s2331_s10 + $0x10] sm:$0xff] %vm430_vm1, %v1079_v20  ;;  %1033 = vst.msk [vmem:[%s2329_s18 + $0x20] sm:$0xff] %vm430_vm1, %v1017_v22  ;;  %v1065_v35 = vmul.f32 %v1017_v22, %v2433_v33  ;;  %v962_v40 = vmax.f32 %v946_v31, 0.0  ;;  %v932_v33 = vmul.f32 %v2492_v32, %v2492_v32  ;;  %v916_v52 = vmul.f32 0.0009765625, %v1495_v10  ;;  %v1007_v10 = vld [vmem:[#allocation7 + $0x50] sm:$0xff]  ;;  %v1010_v22 = vld [vmem:[#allocation7 + $0x68] sm:$0xff] }
 0x284   : > { %v1719_v28 = vpop.eup %1718  ;;  %v1082_v38 = vsub.f32 %v1050_v21, %v1066_v25  ;;  %v1020_v39 = vmul.f32 %v1717_v34, %v1004_v17  ;;  %v961_v46 = vmax.f32 %v945_v36, 0.0  ;;  %v931_v51 = vmul.f32 %v2499_v37, %v2499_v37  ;;  %v1055_v21 = vld [vmem:[#allocation9 + $0x50] sm:$0xff]  ;;  %v1058_v31 = vld [vmem:[#allocation9 + $0x68] sm:$0xff]  ;;  %v1012_v36 = vld [vmem:[#allocation7 + $0x78] sm:$0xff] }
 0x285   : > { %v1081_v41 = vsub.f32 %v1049_v27, %v1065_v35  ;;  %v1019_v43 = vmul.f32 %v1719_v28, %v1003_v29  ;;  %v978_v50 = vadd.f32 1e-05, %v962_v40  ;;  %v915_v57 = vmul.f32 0.0009765625, %v892_v18  ;;  %v1056_v18 = vld [vmem:[#allocation9 + $0x58] sm:$0xff] }
 0x286   : > { %1098 = vst.msk [vmem:[%s2331_s10 + $0x28] sm:$0xff] %vm430_vm1, %v1082_v38  ;;  %1036 = vst.msk [vmem:[%s2329_s18 + $0x38] sm:$0xff] %vm430_vm1, %v1020_v39  ;;  %v1068_v47 = vmul.f32 %v1020_v39, %v2439_v44  ;;  %v977_v56 = vadd.f32 1e-05, %v961_v46  ;;  %v948_v59 = vsub.f32 %v916_v52, %v932_v33  ;;  %v1011_v38 = vld [vmem:[#allocation7 + $0x70] sm:$0xff] }
 0x287   : > { %v1721_v54 = vpop.eup %1720  ;;  %1097 = vst.msk [vmem:[%s2331_s10 + $0x20] sm:$0xff] %vm430_vm1, %v1081_v41  ;;  %1035 = vst.msk [vmem:[%s2329_s18 + $0x30] sm:$0xff] %vm430_vm1, %v1019_v43  ;;  %v1067_v55 = vmul.f32 %v1019_v43, %v2441_v49  ;;  %1728 = vrsqrt.f32 %v978_v50  ;;  %v947_v0 = vsub.f32 %v915_v57, %v931_v51 }
 0x288   : > { %v1723_v44 = vpop.eup %1722  ;;  %v1084_v5 = vsub.f32 %v1052_v42, %v1068_v47  ;;  %v1022_v58 = vmul.f32 %v1721_v54, %v1006_v45  ;;  %1730 = vrsqrt.f32 %v977_v56  ;;  %v964_v4 = vmax.f32 %v948_v59, 0.0 }
 0x289   : > { %v1083_v61 = vsub.f32 %v1051_v2, %v1067_v55  ;;  %v1021_v63 = vmul.f32 %v1723_v44, %v1005_v48  ;;  %v963_v13 = vmax.f32 %v947_v0, 0.0 }
 0x28a   : > { %1100 = vst.msk [vmem:[%s2331_s10 + $0x38] sm:$0xff] %vm430_vm1, %v1084_v5  ;;  %1038 = vst.msk [vmem:[%s2329_s18 + $0x48] sm:$0xff] %vm430_vm1, %v1022_v58  ;;  %v1070_v49 = vmul.f32 %v1022_v58, %v2447_v60  ;;  %v980_v11 = vadd.f32 1e-05, %v964_v4 }
 0x28b   : > { %1099 = vst.msk [vmem:[%s2331_s10 + $0x30] sm:$0xff] %vm430_vm1, %v1083_v61  ;;  %1037 = vst.msk [vmem:[%s2329_s18 + $0x40] sm:$0xff] %vm430_vm1, %v1021_v63  ;;  %v1069_v6 = vmul.f32 %v1021_v63, %v2449_v1  ;;  %v1725_v12 = vpop.eup %1724  ;;  %v979_v15 = vadd.f32 1e-05, %v963_v13 }
 0x28c   : > { %v1086_v9 = vsub.f32 %v1054_v62, %v1070_v49  ;;  %v1727_v60 = vpop.eup %1726  ;;  %v1024_v16 = vmul.f32 %v1725_v12, %v1008_v7  ;;  %1732 = vrsqrt.f32 %v980_v11 }
 0x28d   : > { %v1085_v14 = vsub.f32 %v1053_v3, %v1069_v6  ;;  %v1023_v1 = vmul.f32 %v1727_v60, %v1007_v10  ;;  %1734 = vrsqrt.f32 %v979_v15 }
 0x28e   : > { %1102 = vst.msk [vmem:[%s2331_s10 + $0x48] sm:$0xff] %vm430_vm1, %v1086_v9  ;;  %1040 = vst.msk [vmem:[%s2329_s18 + $0x58] sm:$0xff] %vm430_vm1, %v1024_v16  ;;  %v1072_v20 = vmul.f32 %v1024_v16, %v2455_v19 }
 0x28f   : > { %1101 = vst.msk [vmem:[%s2331_s10 + $0x40] sm:$0xff] %vm430_vm1, %v1085_v14  ;;  %1039 = vst.msk [vmem:[%s2329_s18 + $0x50] sm:$0xff] %vm430_vm1, %v1023_v1  ;;  %v1071_v17 = vmul.f32 %v1023_v1, %v2457_v26  ;;  %v1057_v26 = vld [vmem:[#allocation9 + $0x60] sm:$0xff] }
 0x290   : > { %v1088_v25 = vsub.f32 %v1056_v18, %v1072_v20 }
 0x291   : > { %v1729_v24 = vpop.eup %1728  ;;  %v1087_v29 = vsub.f32 %v1055_v21, %v1071_v17 }
 0x292   : > { %v1731_v27 = vpop.eup %1730  ;;  %v1026_v30 = vmul.f32 %v1729_v24, %v1010_v22  ;;  %1104 = vst.msk [vmem:[%s2331_s10 + $0x58] sm:$0xff] %vm430_vm1, %v1088_v25 }
 0x293   : > { %v1025_v34 = vmul.f32 %v1731_v27, %v1009_v23  ;;  %1103 = vst.msk [vmem:[%s2331_s10 + $0x50] sm:$0xff] %vm430_vm1, %v1087_v29 }
 0x294   : > { %1042 = vst.msk [vmem:[%s2329_s18 + $0x68] sm:$0xff] %vm430_vm1, %v1026_v30  ;;  %v1074_v19 = vmul.f32 %v1026_v30, %v2469_v53  ;;  %v1060_v53 = vld [vmem:[#allocation9 + $0x78] sm:$0xff] }
 0x295   : > { %1041 = vst.msk [vmem:[%s2329_s18 + $0x60] sm:$0xff] %vm430_vm1, %v1025_v34  ;;  %v1073_v35 = vmul.f32 %v1025_v34, %v2483_v8  ;;  %v1059_v8 = vld [vmem:[#allocation9 + $0x70] sm:$0xff] }
 0x296   : > { %v1090_v28 = vsub.f32 %v1058_v31, %v1074_v19  ;;  %v1733_v39 = vpop.eup %1732 }
 0x297   : > { %v1089_v40 = vsub.f32 %v1057_v26, %v1073_v35  ;;  %v1735_v41 = vpop.eup %1734  ;;  %v1028_v42 = vmul.f32 %v1733_v39, %v1012_v36 }
 0x298   : > { %1106 = vst.msk [vmem:[%s2331_s10 + $0x68] sm:$0xff] %vm430_vm1, %v1090_v28  ;;  %v1027_v43 = vmul.f32 %v1735_v41, %v1011_v38 }
 0x299   : > { %1105 = vst.msk [vmem:[%s2331_s10 + $0x60] sm:$0xff] %vm430_vm1, %v1089_v40  ;;  %1044 = vst.msk [vmem:[%s2329_s18 + $0x78] sm:$0xff] %vm430_vm1, %v1028_v42  ;;  %v1076_v45 = vmul.f32 %v1028_v42, %v2492_v32 }
 0x29a   : > { %1043 = vst.msk [vmem:[%s2329_s18 + $0x70] sm:$0xff] %vm430_vm1, %v1027_v43  ;;  %v1075_v46 = vmul.f32 %v1027_v43, %v2499_v37 }
 0x29b   : > { %v1092_v33 = vsub.f32 %v1060_v53, %v1076_v45 }
 0x29c   : > { %v1091_v47 = vsub.f32 %v1059_v8, %v1075_v46 }
 0x29d   : > { %1108 = vst.msk [vmem:[%s2331_s10 + $0x78] sm:$0xff] %vm430_vm1, %v1092_v33 }
 0x29e   : > { %1107 = vst.msk [vmem:[%s2331_s10 + $0x70] sm:$0xff] %vm430_vm1, %v1091_v47 }
 0x29f PF: > { %s2720_s24 = sld [smem:[#allocation22_spill]]  ;;  %s1318_s7 = sshll.u32 %s2000_s25, 11 }
 0x2a0   : > { %s2721_s28 = sld [smem:[#allocation26_spill]]  ;;  %s1128_s2 = sshll.u32 %s2329_s18, 4  ;;  %s2568_s2 = int_to_ptr.vmem [resolvable:$true] %s1128_s2 }
 0x2a1   : > { %s1110_s8 = scalar_lea.sflag [#allocation6], %s2326_s13  ;;  %s1850_s6 = scalar_lea.vmem %s2568_s2, 2048 }
 0x2a2   : > { %p1851_p6 = scmp.ne.s32.totalorder %s2568_s2, %s1850_s6  ;;  %s2022_s15 = smov [#allocation12]  }
 0x2a3   : > { %s1854_s29 = sshll.u32 %s2022_s15, 4  ;;  %s1855_s29 = int_to_ptr.vmem [resolvable:$false] %s1854_s29 }
 0x2a4   : > { %s1856_s1 = scalar_lea.vmem %s1855_s29, 4096  ;;  %p1857_p9 = scmp.lt.s32.totalorder %s2568_s2, %s1855_s29 }
 0x2a5   : > { %p2723_p0 = scmp.ne.s32.totalorder %s2720_s24, 0  ;;  %p1858_p10 = scmp.lt.s32.totalorder %s1856_s1, %s1850_s6 }
 0x2a6   : > { %s2722_s30 = smov %s2721_s28  ;;  %s2565_s16 = scalar_lea.hbm %s2721_s28, %s1318_s7 }
 0x2a7   : > { %p1852_p7 = pnand %p1851_p6, %p2723_p0  ;;  %p1859_p13 = por %p1858_p10, %p1857_p9 }
 0x2a9   : > { %p1853_p5 = pneg %p1852_p7 }
 0x2ab   : > { %p1860_p2 = pnand %p1859_p13, %p1853_p5 }
 0x2ad   : > { %1863 = shalt.err (!%p1860_p2)
}
 0x2ae   : > { %s1864_s12 = scalar_lea.hbm %s2565_s16, 2048  ;;  %s1868_s21 = scalar_lea.hbm %s2722_s30, 4096 }
 0x2af   : > { %p1865_p8 = scmp.ne.s32.totalorder %s2565_s16, %s1864_s12  ;;  %p1869_p4 = scmp.lt.u32.totalorder %s2565_s16, %s2722_s30 }
 0x2b0   : > { %p1870_p12 = scmp.lt.u32.totalorder %s1868_s21, %s1864_s12  ;;  %p1872_p6 = scmp.lt.u32.totalorder %s1864_s12, %s2565_s16 }
 0x2b1   : > { %p1866_p11 = pnand %p1865_p8, %p2723_p0 }
 0x2b2   : > { %p1871_p3 = por %p1870_p12, %p1869_p4 }
 0x2b3   : > { %p1867_p1 = pneg %p1866_p11 }
 0x2b4   : > { %p1873_p7 = por %p1872_p6, %p1871_p3 }
 0x2b6   : > { %p1874_p5 = pnand %p1873_p7, %p1867_p1 }
 0x2b8   : > { %1877 = shalt.err (!%p1874_p5)
}
 0x2b9   : > { %s2023_s6 = smov 128   ;;  %s2024_s15 = smov 8  }
 0x2ba   : > { %1574 = dma.vmem_to_hbm [thread:$0]  (%p2723_p0), %s2568_s2, 2048, %s2565_s16, %s1110_s8, %s2023_s6, %s2023_s6, %s2024_s15  }
 0x2bb   : > { %s2724_s12 = sld [smem:[#allocation27_spill]]  ;;  %s1144_s18 = sshll.u32 %s2331_s10, 4  ;;  %s2605_s18 = int_to_ptr.vmem [resolvable:$true] %s1144_s18 }
 0x2bc   : > { %s1115_s21 = scalar_lea.sflag [#allocation14], %s2326_s13  ;;  %s1878_s4 = scalar_lea.vmem %s2605_s18, 2048 }
 0x2bd   : > { %p1879_p9 = scmp.ne.s32.totalorder %s2605_s18, %s1878_s4  ;;  %s2025_s28 = smov [#allocation13]  }
 0x2be   : > { %s1882_s16 = sshll.u32 %s2025_s28, 4  ;;  %s1883_s16 = int_to_ptr.vmem [resolvable:$false] %s1882_s16 }
 0x2bf   : > { %p1880_p10 = pnand %p1879_p9, %p2723_p0  ;;  %s1884_s25 = scalar_lea.vmem %s1883_s16, 4096 }
 0x2c0   : > { %p1885_p2 = scmp.lt.s32.totalorder %s2605_s18, %s1883_s16  ;;  %p1886_p8 = scmp.lt.s32.totalorder %s1884_s25, %s1878_s4 }
 0x2c1   : > { %s2602_s17 = scalar_lea.hbm %s2724_s12, %s1318_s7  ;;  %p1881_p13 = pneg %p1880_p10 }
 0x2c2   : > { %p1887_p11 = por %p1886_p8, %p1885_p2 }
 0x2c4   : > { %p1888_p1 = pnand %p1887_p11, %p1881_p13 }
 0x2c6   : > { %1891 = shalt.err (!%p1888_p1)
}
 0x2c7   : > { %s1892_s10 = scalar_lea.hbm %s2602_s17, 2048  ;;  %s1896_s8 = scalar_lea.hbm %s2724_s12, 4096 }
 0x2c8   : > { %p1893_p4 = scmp.ne.s32.totalorder %s2602_s17, %s1892_s10  ;;  %p1897_p6 = scmp.lt.u32.totalorder %s2602_s17, %s2724_s12 }
 0x2c9   : > { %p1898_p7 = scmp.lt.u32.totalorder %s1896_s8, %s1892_s10  ;;  %p1900_p9 = scmp.lt.u32.totalorder %s1892_s10, %s2602_s17 }
 0x2ca   : > { %p1894_p12 = pnand %p1893_p4, %p2723_p0 }
 0x2cb   : > { %p1899_p5 = por %p1898_p7, %p1897_p6 }
 0x2cc   : > { %p1895_p3 = pneg %p1894_p12 }
 0x2cd   : > { %p1901_p10 = por %p1900_p9, %p1899_p5 }
 0x2cf   : > { %p1902_p13 = pnand %p1901_p10, %p1895_p3 }
 0x2d1   : > { %1905 = shalt.err (!%p1902_p13)
}
 0x2d2   : > { %1575 = dma.vmem_to_hbm [thread:$0]  (%p2723_p0), %s2605_s18, 2048, %s2602_s17, %s1115_s21, %s2023_s6, %s2023_s6, %s2024_s15  }
 0x2d3 PF: > { %s2725_s4 = sld [smem:[#allocation21_spill]]  ;;  %s2726_s28 = sld [smem:[#allocation20_spill]] }
 0x2d4   : > { %s2727_s16 = sld [smem:[#allocation23_spill]] }
 0x2d9   : > { %p1606_p2 = scmp.ge.s32.totalorder %s2725_s4, 2  ;;  %s1159_s25 = sand.u32 1, %s2726_s28  }
 0x2da   : > { %p2728_p8 = scmp.ne.s32.totalorder %s2727_s16, 0  ;;  %s1160_s10 = scalar_lea.sflag [#allocation6], %s1159_s25 }
 0x2dc   : > { %p1593_p11 = pnand %p1606_p2, %p2728_p8 }
 0x2de   : > { %1963 = dma.done.wait (!%p1593_p11), %s1160_s10, 2048  }
 0x2df   : > { %1965 = vsyncadd (!%p1593_p11), %s1160_s10, 4294965248  ;;  %s1169_s24 = scalar_lea.sflag [#allocation14], %s1159_s25 }
 0x2e0   : > { %1967 = dma.done.wait (!%p1593_p11), %s1169_s24, 2048  }
 0x2e1   : > { %1969 = vsyncadd (!%p1593_p11), %s1169_s24, 4294965248  ;;  %s27_s28 = sadd.s32 1, %s2725_s4   ;;  %s2729_s18 = smov %s1976_s19 }
 0x2e2   : > { %p24_p1 = scmp.ge.s32.totalorder %s27_s28, 6   ;;  %s2730_s19 = smov %s1980_s20 }
 0x2e3   : > { %s2731_s20 = smov %s2271_s11  ;;  %s2732_s21 = smov %s1988_s22 }
 0x2e4   : > { %s2733_s22 = smov %s1992_s23  ;;  %s2734_s23 = smov %s2276_s14 }
 0x2e5   : > { %s2735_s24 = smov %s2004_s26  ;;  %s2736_s25 = smov %s2008_s27 }
 0x2e6   : > { %s2737_s26 = smov %s2740_s9  ;;  %s2738_s27 = smov %s2744_s5 }
 0x2e7   :  { %26 = sbr.rel (!%p24_p1) target bundleno = 18 (0x12), region = 118 }
 0x2ee   :  { %1174 = vsyncpa [#allocation5], 1 }
 0x2ef   :  { %1176 = vsyncpa [#allocation5 + $0x1], 1 }
 0x2f0   :  { %1177 = vsyncpa [#allocation8], 1 }
 0x2f1   :  { %1178 = vsyncpa [#allocation11], 1 }
 0x2f2   :  { %1179 = vsyncpa [#allocation6], 1 }
 0x2f3   :  { %1181 = vsyncpa [#allocation6 + $0x1], 1 }
 0x2f4   :  { %1182 = vsyncpa [#allocation14], 1 }
 0x2f5   :  { %1184 = vsyncpa [#allocation14 + $0x1], 1 }

</bundles_post_ra>
